<compile_context>
chip_gen: v6e
topology: v6e:2x2x1
jax: 0.10.0
libtpu: 0.0.40
codegen_flags: <defaults>
</compile_context>

<pallas_src>
import functools
import jax
import jax.numpy as jnp
from jax import lax
from jax.experimental import pallas as pl
from jax.experimental.pallas import tpu as pltpu

# Small, self-consistent toy shapes (stand-ins for the CLIP text tower).
N, L, D, H, P, LAYERS = 2, 8, 32, 4, 16, 2
DH = D // H
FF = 4 * D
P_PAD = 128                      # lane-dense output width; sliced back to P outside
NEG_INF = -1e30
SCALE = 1.0 / (DH ** 0.5)


def _layernorm(x, g, b, eps=1e-5):
    mu = jnp.mean(x, axis=-1, keepdims=True)
    var = jnp.mean((x - mu) ** 2, axis=-1, keepdims=True)
    return (x - mu) * lax.rsqrt(var + eps) * g + b


# ----------------------------------------------------------------------------
# The fused encoder kernel. grid = (LAYERS,), "arbitrary".
# ----------------------------------------------------------------------------
def _encoder_kernel(batch, tokens,
                    x_in_ref, pos_ref, eot_ref,
                    ln1w_ref, ln1b_ref,
                    wqkv_ref, bqkv_ref, wo_ref, bo_ref,
                    ln2w_ref, ln2b_ref,
                    w1_ref, b1_ref, w2_ref, b2_ref,
                    lnfw_ref, lnfb_ref, proj_ref,
                    o_ref, x_scr):
    layer = pl.program_id(0)

    # Prologue: x = prompts + positional_embedding (then resident in VMEM scratch).
    @pl.when(layer == 0)
    def _():
        pos_b = jnp.broadcast_to(pos_ref[...][None], (batch, L, D))
        x_scr[...] = x_in_ref[...] + pos_b.reshape(tokens, D)

    x = x_scr[...]                                                   # (T, D) f32

    # ---- multi-head self-attention (pre-LN, per-batch block-diagonal) ----
    h = _layernorm(x, ln1w_ref[0], ln1b_ref[0])

    # One fused QKV matmul: full 3D-wide MXU output, no per-head projections.
    qkv = jnp.dot(h, wqkv_ref[0].astype(jnp.float32),
                  preferred_element_type=jnp.float32) + bqkv_ref[0]  # (T, 3D)
    qkv3 = qkv.reshape(batch, L, 3 * D)                              # split rows only

    # Per-head lane slices (static, zero-copy views) stacked along the batch
    # axis -> (H*B, L, DH); all score/context matmuls are one batched einsum.
    q = jnp.concatenate(
        [qkv3[:, :, hd * DH:(hd + 1) * DH] for hd in range(H)], axis=0)
    k = jnp.concatenate(
        [qkv3[:, :, D + hd * DH:D + (hd + 1) * DH] for hd in range(H)], axis=0)
    v = jnp.concatenate(
        [qkv3[:, :, 2 * D + hd * DH:2 * D + (hd + 1) * DH] for hd in range(H)], axis=0)

    # Block-diagonal scores: (H*B, L, L) only -- no cross-batch positions.
    s = jnp.einsum('gld,gmd->glm', q, k,
                   preferred_element_type=jnp.float32) * SCALE
    row = lax.broadcasted_iota(jnp.int32, (L, L), 0)
    col = lax.broadcasted_iota(jnp.int32, (L, L), 1)
    causal = jnp.where(col <= row, jnp.float32(0.0), jnp.float32(NEG_INF))
    s = s + causal[None]                                             # in-kernel mask

    m = jnp.max(s, axis=-1, keepdims=True)
    p = jnp.exp(s - m)
    denom = jnp.sum(p, axis=-1, keepdims=True)
    p = p * pl.reciprocal(denom, approx=True)                        # EUP divide

    ctx = jnp.einsum('glm,gmd->gld', p, v,
                     preferred_element_type=jnp.float32)             # (H*B, L, DH)

    # Re-assemble heads along lanes (head-major columns h*DH+d) -> (T, D), then
    # one full-depth (T, D) @ (D, D) output projection.
    ctx_full = jnp.concatenate(
        [ctx[hd * batch:(hd + 1) * batch] for hd in range(H)], axis=-1)  # (B, L, D)
    ctx2 = ctx_full.reshape(tokens, D)
    x = x + jnp.dot(ctx2, wo_ref[0].astype(jnp.float32),
                    preferred_element_type=jnp.float32) + bo_ref[0]

    # ---- MLP with QuickGELU ----
    h2 = _layernorm(x, ln2w_ref[0], ln2b_ref[0])
    a = jnp.dot(h2, w1_ref[0].astype(jnp.float32),
                preferred_element_type=jnp.float32) + b1_ref[0]
    a = a * jax.nn.sigmoid(1.702 * a)
    x = x + jnp.dot(a, w2_ref[0].astype(jnp.float32),
                    preferred_element_type=jnp.float32) + b2_ref[0]

    x_scr[...] = x

    # Epilogue: one-hot EOT gather (MXU) -> ln_final -> projection.
    @pl.when(layer == pl.num_programs(0) - 1)
    def _():
        col_t = lax.broadcasted_iota(jnp.int32, (batch, tokens), 1)
        onehot = (col_t == eot_ref[...]).astype(jnp.float32)         # (B, T)
        eot_x = jnp.dot(onehot, x_scr[...],
                        preferred_element_type=jnp.float32)          # (B, D)
        eot_x = _layernorm(eot_x, lnfw_ref[...], lnfb_ref[...])
        o_ref[...] = jnp.dot(eot_x, proj_ref[...],
                             preferred_element_type=jnp.float32).astype(o_ref.dtype)


# ----------------------------------------------------------------------------
# BlockSpec helpers (index maps receive only the layer grid index).
# ----------------------------------------------------------------------------
def _layer_spec(shape):
    nd = len(shape)
    return pl.BlockSpec((1,) + tuple(shape[1:]),
                        lambda l, _nd=nd: (l,) + (0,) * (_nd - 1))


def _const_spec(shape):
    nd = len(shape)
    return pl.BlockSpec(tuple(shape), lambda l, _nd=nd: (0,) * _nd)


# ----------------------------------------------------------------------------
# Host-side weight plumbing: stack per-layer params, pre-transpose, and stream
# the large matrices in bfloat16 (half the per-layer DMA / weight VMEM).
# ----------------------------------------------------------------------------
def pack_params(params):
    lyr = params['layers']

    def stack(fn, dt=jnp.float32):
        return jnp.stack([fn(p) for p in lyr], axis=0).astype(dt)

    packed = {
        'ln1_w': stack(lambda p: p['ln1_w'].reshape(1, D)),
        'ln1_b': stack(lambda p: p['ln1_b'].reshape(1, D)),
        'wqkv': stack(lambda p: p['wqkv'].T, jnp.bfloat16),        # (D, 3D), head-major cols
        'bqkv': stack(lambda p: p['bqkv'].reshape(1, 3 * D)),
        'wo':   stack(lambda p: p['wo'].T, jnp.bfloat16),          # (D, D), rows = h*DH+d
        'bo':   stack(lambda p: p['bo'].reshape(1, D)),
        'ln2_w': stack(lambda p: p['ln2_w'].reshape(1, D)),
        'ln2_b': stack(lambda p: p['ln2_b'].reshape(1, D)),
        'w1':   stack(lambda p: p['w1'].T, jnp.bfloat16),          # (D, FF)
        'b1':   stack(lambda p: p['b1'].reshape(1, FF)),
        'w2':   stack(lambda p: p['w2'].T, jnp.bfloat16),          # (FF, D)
        'b2':   stack(lambda p: p['b2'].reshape(1, D)),
        'lnf_w': params['lnf_w'],
        'lnf_b': params['lnf_b'],
        # zero-pad the projection to 128 output lanes -> lane-dense stores.
        'proj': jnp.zeros((D, P_PAD), jnp.float32).at[:, :P].set(params['proj']),
    }
    return packed


_LAYER_NAMES = ('ln1_w', 'ln1_b', 'wqkv', 'bqkv', 'wo', 'bo',
                'ln2_w', 'ln2_b', 'w1', 'b1', 'w2', 'b2')


def fused_text_encoder(prompts_flat, pos, eot_rows, packed, batch):
    tokens = batch * L

    in_arrays = (prompts_flat, pos, eot_rows) \
        + tuple(packed[n] for n in _LAYER_NAMES) \
        + (packed['lnf_w'], packed['lnf_b'], packed['proj'])

    in_specs = [_const_spec(prompts_flat.shape), _const_spec(pos.shape),
                _const_spec(eot_rows.shape)] \
        + [_layer_spec(packed[n].shape) for n in _LAYER_NAMES] \
        + [_const_spec(packed['lnf_w'].shape), _const_spec(packed['lnf_b'].shape),
           _const_spec(packed['proj'].shape)]

    kernel = functools.partial(_encoder_kernel, batch, tokens)

    # NOTE: 32 MiB is the v7x-safe budget; on v6e at real CLIP scale raise it
    # (64-96 MiB) for deeper weight buffering / larger resident token blocks.
    return pl.pallas_call(
        kernel,
        out_shape=jax.ShapeDtypeStruct((batch, P_PAD), jnp.float32),
        grid_spec=pltpu.PrefetchScalarGridSpec(
            num_scalar_prefetch=0,
            grid=(LAYERS,),
            in_specs=in_specs,
            out_specs=pl.BlockSpec((batch, P_PAD), lambda l: (0, 0)),
            scratch_shapes=[pltpu.VMEM((tokens, D), jnp.float32)]),
        compiler_params=pltpu.CompilerParams(
            dimension_semantics=("arbitrary",),
            vmem_limit_bytes=32 * 1024 * 1024),
    )(*in_arrays)


# ----------------------------------------------------------------------------
# TextEncoder forward: all prompt-dict keys batched into ONE fused kernel call.
# ----------------------------------------------------------------------------
def text_encoder(prompts, tokenized_prompts, params):
    keys = list(prompts.keys())
    batch = len(keys) * N

    v_stack = jnp.concatenate([prompts[k] for k in keys], axis=0)          # (B, L, D)
    tok_stack = jnp.concatenate([tokenized_prompts[k] for k in keys], 0)   # (B, L)

    prompts_flat = v_stack.reshape(batch * L, D).astype(jnp.float32)       # (T, D)
    eot = jnp.argmax(tok_stack, axis=-1).astype(jnp.int32)                 # (B,)
    eot_rows = (jnp.arange(batch, dtype=jnp.int32) * L + eot).reshape(batch, 1)

    packed = pack_params(params)
    out_full = fused_text_encoder(prompts_flat, params['pos_emb'].astype(jnp.float32),
                                  eot_rows, packed, batch)
    out_full = out_full[:, :P]                                             # drop lane pad

    return {k: out_full[i * N:(i + 1) * N] for i, k in enumerate(keys)}


# ----------------------------------------------------------------------------
# Pure-JAX reference (same math; weights rounded to bf16 like the kernel's
# bf16 weight streaming -- CLIP itself runs this tower in reduced precision).
# ----------------------------------------------------------------------------
def ref_text_encoder(prompts, tokenized_prompts, params):
    bf = lambda w: w.astype(jnp.bfloat16).astype(jnp.float32)
    tri = jnp.where(jnp.tril(jnp.ones((L, L), bool)), 0.0, NEG_INF)
    out = {}
    for k, v in prompts.items():
        x = v + params['pos_emb'][None]
        for p in params['layers']:
            h = _layernorm(x, p['ln1_w'], p['ln1_b'])
            qkv = h @ bf(p['wqkv']).T + p['bqkv']
            q, kk, vv = jnp.split(qkv, 3, axis=-1)
            q = q.reshape(N, L, H, DH)
            kk = kk.reshape(N, L, H, DH)
            vv = vv.reshape(N, L, H, DH)
            s = jnp.einsum('nqhd,nkhd->nhqk', q, kk) / jnp.sqrt(DH) + tri
            pr = jax.nn.softmax(s, axis=-1)
            a = jnp.einsum('nhqk,nkhd->nqhd', pr, vv).reshape(N, L, D)
            x = x + a @ bf(p['wo']).T + p['bo']
            h2 = _layernorm(x, p['ln2_w'], p['ln2_b'])
            a2 = h2 @ bf(p['w1']).T + p['b1']
            a2 = a2 * jax.nn.sigmoid(1.702 * a2)
            x = x + a2 @ bf(p['w2']).T + p['b2']
        eot = jnp.argmax(tokenized_prompts[k], axis=-1)
        xe = x[jnp.arange(N), eot]
        xe = _layernorm(xe, params['lnf_w'], params['lnf_b'])
        out[k] = xe @ params['proj']
    return out


# ----------------------------------------------------------------------------
# Deterministic parameter init (synthetic; shapes follow CLIP's text tower).
# ----------------------------------------------------------------------------
def init_params(key):
    def nrm(k, shape, scale=0.02):
        return scale * jax.random.normal(k, shape, jnp.float32)

    keys = jax.random.split(key, 4 + LAYERS)
    params = {
        'pos_emb': nrm(keys[0], (L, D)),
        'lnf_w': 1.0 + nrm(keys[1], (1, D), 0.1),
        'lnf_b': nrm(keys[2], (1, D), 0.1),
        'proj': nrm(keys[3], (D, P), D ** -0.5),
        'layers': [],
    }
    for i in range(LAYERS):
        ks = jax.random.split(keys[4 + i], 12)
        params['layers'].append({
            'ln1_w': 1.0 + nrm(ks[0], (1, D), 0.1),
            'ln1_b': nrm(ks[1], (1, D), 0.1),
            'wqkv': nrm(ks[2], (3 * D, D)),
            'bqkv': nrm(ks[3], (1, 3 * D)),
            'wo': nrm(ks[4], (D, D)),
            'bo': nrm(ks[5], (1, D)),
            'ln2_w': 1.0 + nrm(ks[6], (1, D), 0.1),
            'ln2_b': nrm(ks[7], (1, D), 0.1),
            'w1': nrm(ks[8], (4 * D, D)),
            'b1': nrm(ks[9], (1, 4 * D)),
            'w2': nrm(ks[10], (D, 4 * D)),
            'b2': nrm(ks[11], (1, D)),
        })
    return params


if __name__ == "__main__":
    root = jax.random.PRNGKey(0)
    kp, k1, k2, kt = jax.random.split(root, 4)
    params = init_params(kp)

    # prompts: OrderedDict-like of learned prompt embeddings, each (N, L, D)
    prompts = {
        "pos": jax.random.normal(k1, (N, L, D), jnp.float32),
        "neg": jax.random.normal(k2, (N, L, D), jnp.float32),
    }
    # tokenized prompts: (N, L) int tokens; argmax(-1) locates the EOT token.
    base = jax.random.randint(kt, (N, L), 1, 100)
    eot_pos = {"pos": jnp.array([5, 3]), "neg": jnp.array([2, 7])}
    tokenized = {
        k: base.at[jnp.arange(N), v].set(10_000) for k, v in eot_pos.items()
    }

    out = text_encoder(prompts, tokenized, params)
    out = {k: jax.block_until_ready(v) for k, v in out.items()}

    ref = ref_text_encoder(prompts, tokenized, params)
    for k in prompts:
        assert out[k].shape == (N, P)
        err = float(jnp.max(jnp.abs(out[k] - ref[k])))
        assert err < 2e-3, f"mismatch for key {k}: {err}"

    print("KERNEL_OK")
</pallas_src>

<mosaic_0001>
module attributes {stable_mosaic.version = 11 : i64} {
  func.func @_encoder_kernel(%arg0: i32, %arg1: memref<32x32xf32, #tpu.memory_space<vmem>>, %arg2: memref<8x32xf32, #tpu.memory_space<vmem>>, %arg3: memref<4x1xi32, #tpu.memory_space<vmem>>, %arg4: memref<1x1x32xf32, #tpu.memory_space<vmem>>, %arg5: memref<1x1x32xf32, #tpu.memory_space<vmem>>, %arg6: memref<1x32x96xbf16, #tpu.memory_space<vmem>>, %arg7: memref<1x1x96xf32, #tpu.memory_space<vmem>>, %arg8: memref<1x32x32xbf16, #tpu.memory_space<vmem>>, %arg9: memref<1x1x32xf32, #tpu.memory_space<vmem>>, %arg10: memref<1x1x32xf32, #tpu.memory_space<vmem>>, %arg11: memref<1x1x32xf32, #tpu.memory_space<vmem>>, %arg12: memref<1x32x128xbf16, #tpu.memory_space<vmem>>, %arg13: memref<1x1x128xf32, #tpu.memory_space<vmem>>, %arg14: memref<1x128x32xbf16, #tpu.memory_space<vmem>>, %arg15: memref<1x1x32xf32, #tpu.memory_space<vmem>>, %arg16: memref<1x32xf32, #tpu.memory_space<vmem>>, %arg17: memref<1x32xf32, #tpu.memory_space<vmem>>, %arg18: memref<32x128xf32, #tpu.memory_space<vmem>>, %arg19: memref<4x128xf32, #tpu.memory_space<vmem>>, %arg20: memref<32x32xf32, #tpu.memory_space<vmem>>) attributes {dimension_semantics = [#tpu.dimension_semantics<arbitrary>], iteration_bounds = array<i64: 2>, scalar_prefetch = 0 : i64, scratch_operands = 1 : i64, tpu.core_type = #tpu.core_type<tc>, window_params = [{pipeline_mode = #tpu.pipeline_mode<synchronous>, transform_indices = @transform_0, window_bounds = array<i64: 32, 32>}, {pipeline_mode = #tpu.pipeline_mode<synchronous>, transform_indices = @transform_1, window_bounds = array<i64: 8, 32>}, {pipeline_mode = #tpu.pipeline_mode<synchronous>, transform_indices = @transform_2, window_bounds = array<i64: 4, 1>}, {transform_indices = @transform_3, window_bounds = array<i64: 1, 1, 32>}, {transform_indices = @transform_4, window_bounds = array<i64: 1, 1, 32>}, {transform_indices = @transform_5, window_bounds = array<i64: 1, 32, 96>}, {transform_indices = @transform_6, window_bounds = array<i64: 1, 1, 96>}, {transform_indices = @transform_7, window_bounds = array<i64: 1, 32, 32>}, {transform_indices = @transform_8, window_bounds = array<i64: 1, 1, 32>}, {transform_indices = @transform_9, window_bounds = array<i64: 1, 1, 32>}, {transform_indices = @transform_10, window_bounds = array<i64: 1, 1, 32>}, {transform_indices = @transform_11, window_bounds = array<i64: 1, 32, 128>}, {transform_indices = @transform_12, window_bounds = array<i64: 1, 1, 128>}, {transform_indices = @transform_13, window_bounds = array<i64: 1, 128, 32>}, {transform_indices = @transform_14, window_bounds = array<i64: 1, 1, 32>}, {pipeline_mode = #tpu.pipeline_mode<synchronous>, transform_indices = @transform_15, window_bounds = array<i64: 1, 32>}, {pipeline_mode = #tpu.pipeline_mode<synchronous>, transform_indices = @transform_16, window_bounds = array<i64: 1, 32>}, {pipeline_mode = #tpu.pipeline_mode<synchronous>, transform_indices = @transform_17, window_bounds = array<i64: 32, 128>}, {pipeline_mode = #tpu.pipeline_mode<synchronous>, transform_indices = @transform_18, window_bounds = array<i64: 4, 128>}]} {
    %c0_i32 = arith.constant 0 : i32
    %0 = arith.cmpi eq, %arg0, %c0_i32 : i32
    %1 = arith.extui %0 : i1 to i32
    %c0_i32_0 = arith.constant 0 : i32
    %2 = arith.cmpi ne, %1, %c0_i32_0 : i32
    scf.if %2 {
      %c0_63 = arith.constant 0 : index
      %c0_64 = arith.constant 0 : index
      %147 = vector.load %arg2[%c0_63, %c0_64] : memref<8x32xf32, #tpu.memory_space<vmem>>, vector<8x32xf32>
      %148 = vector.shape_cast %147 : vector<8x32xf32> to vector<1x8x32xf32>
      %149 = vector.shape_cast %148 : vector<1x8x32xf32> to vector<1x8x32xf32>
      %150 = vector.broadcast %149 : vector<1x8x32xf32> to vector<4x8x32xf32>
      %c0_65 = arith.constant 0 : index
      %c0_66 = arith.constant 0 : index
      %151 = vector.load %arg1[%c0_65, %c0_66] : memref<32x32xf32, #tpu.memory_space<vmem>>, vector<32x32xf32>
      %152 = vector.shape_cast %150 : vector<4x8x32xf32> to vector<32x32xf32>
      %153 = arith.addf %151, %152 : vector<32x32xf32>
      %c0_67 = arith.constant 0 : index
      %c0_68 = arith.constant 0 : index
      %154 = vector.load %arg20[%c0_67, %c0_68] : memref<32x32xf32, #tpu.memory_space<vmem>>, vector<32x32xf32>
      tpu.vector_store %arg20[%c0_67, %c0_68], %153 {strides = array<i32>} : memref<32x32xf32, #tpu.memory_space<vmem>>, vector<32x32xf32>,
    } else {
    }
    %c0 = arith.constant 0 : index
    %c0_1 = arith.constant 0 : index
    %3 = vector.load %arg20[%c0, %c0_1] : memref<32x32xf32, #tpu.memory_space<vmem>>, vector<32x32xf32>
    %c0_2 = arith.constant 0 : index
    %c0_3 = arith.constant 0 : index
    %c0_4 = arith.constant 0 : index
    %4 = vector.load %arg4[%c0_2, %c0_3, %c0_4] : memref<1x1x32xf32, #tpu.memory_space<vmem>>, vector<1x1x32xf32>
    %5 = vector.shape_cast %4 : vector<1x1x32xf32> to vector<1x32xf32>
    %c0_5 = arith.constant 0 : index
    %c0_6 = arith.constant 0 : index
    %c0_7 = arith.constant 0 : index
    %6 = vector.load %arg5[%c0_5, %c0_6, %c0_7] : memref<1x1x32xf32, #tpu.memory_space<vmem>>, vector<1x1x32xf32>
    %7 = vector.shape_cast %6 : vector<1x1x32xf32> to vector<1x32xf32>
    %cst = arith.constant dense<0.000000e+00> : vector<32xf32>
    %8 = vector.multi_reduction <add>, %3, %cst [1] : vector<32x32xf32> to vector<32xf32>
    %9 = vector.shape_cast %8 : vector<32xf32> to vector<32x1xf32>
    %cst_8 = arith.constant 3.200000e+01 : f32
    %10 = vector.broadcast %cst_8 : f32 to vector<32x1xf32>
    %11 = arith.divf %9, %10 : vector<32x1xf32>
    %12 = vector.broadcast %11 : vector<32x1xf32> to vector<32x32xf32>
    %13 = arith.subf %3, %12 : vector<32x32xf32>
    %14 = arith.mulf %13, %13 : vector<32x32xf32>
    %cst_9 = arith.constant dense<0.000000e+00> : vector<32xf32>
    %15 = vector.multi_reduction <add>, %14, %cst_9 [1] : vector<32x32xf32> to vector<32xf32>
    %16 = vector.shape_cast %15 : vector<32xf32> to vector<32x1xf32>
    %cst_10 = arith.constant 3.200000e+01 : f32
    %17 = vector.broadcast %cst_10 : f32 to vector<32x1xf32>
    %18 = arith.divf %16, %17 : vector<32x1xf32>
    %19 = vector.broadcast %11 : vector<32x1xf32> to vector<32x32xf32>
    %20 = arith.subf %3, %19 : vector<32x32xf32>
    %cst_11 = arith.constant 9.99999974E-6 : f32
    %21 = vector.broadcast %cst_11 : f32 to vector<32x1xf32>
    %22 = arith.addf %18, %21 : vector<32x1xf32>
    %23 = math.rsqrt %22 : vector<32x1xf32>
    %24 = vector.broadcast %23 : vector<32x1xf32> to vector<32x32xf32>
    %25 = arith.mulf %20, %24 : vector<32x32xf32>
    %26 = vector.broadcast %5 : vector<1x32xf32> to vector<32x32xf32>
    %27 = arith.mulf %25, %26 : vector<32x32xf32>
    %28 = vector.broadcast %7 : vector<1x32xf32> to vector<32x32xf32>
    %29 = arith.addf %27, %28 : vector<32x32xf32>
    %c0_12 = arith.constant 0 : index
    %c0_13 = arith.constant 0 : index
    %c0_14 = arith.constant 0 : index
    %30 = vector.load %arg6[%c0_12, %c0_13, %c0_14] : memref<1x32x96xbf16, #tpu.memory_space<vmem>>, vector<1x32x96xbf16>
    %31 = vector.shape_cast %30 : vector<1x32x96xbf16> to vector<32x96xbf16>
    %32 = arith.extf %31 : vector<32x96xbf16> to vector<32x96xf32>
    %cst_15 = arith.constant dense<0.000000e+00> : vector<32x96xf32>
    %33 = tpu.matmul %29, %32, %cst_15 {dimension_numbers = #tpu.dot_dimension_numbers<[1], [0], [0], [1], [0, 0, 1, 1], [], []>} : vector<32x32xf32>, vector<32x96xf32>, vector<32x96xf32> -> vector<32x96xf32>
    %c0_16 = arith.constant 0 : index
    %c0_17 = arith.constant 0 : index
    %c0_18 = arith.constant 0 : index
    %34 = vector.load %arg7[%c0_16, %c0_17, %c0_18] : memref<1x1x96xf32, #tpu.memory_space<vmem>>, vector<1x1x96xf32>
    %35 = vector.shape_cast %34 : vector<1x1x96xf32> to vector<1x96xf32>
    %36 = vector.broadcast %35 : vector<1x96xf32> to vector<32x96xf32>
    %37 = arith.addf %33, %36 : vector<32x96xf32>
    %38 = vector.shape_cast %37 : vector<32x96xf32> to vector<4x8x96xf32>
    %39 = vector.extract_strided_slice %38 {offsets = [0, 0, 0], sizes = [4, 8, 8], strides = [1, 1, 1]} : vector<4x8x96xf32> to vector<4x8x8xf32>
    %40 = vector.extract_strided_slice %38 {offsets = [0, 0, 8], sizes = [4, 8, 8], strides = [1, 1, 1]} : vector<4x8x96xf32> to vector<4x8x8xf32>
    %41 = vector.extract_strided_slice %38 {offsets = [0, 0, 16], sizes = [4, 8, 8], strides = [1, 1, 1]} : vector<4x8x96xf32> to vector<4x8x8xf32>
    %42 = vector.extract_strided_slice %38 {offsets = [0, 0, 24], sizes = [4, 8, 8], strides = [1, 1, 1]} : vector<4x8x96xf32> to vector<4x8x8xf32>
    %43 = tpu.concatenate %39, %40, %41, %42 in 0 : vector<4x8x8xf32>, vector<4x8x8xf32>, vector<4x8x8xf32>, vector<4x8x8xf32> -> vector<16x8x8xf32>
    %44 = vector.extract_strided_slice %38 {offsets = [0, 0, 32], sizes = [4, 8, 8], strides = [1, 1, 1]} : vector<4x8x96xf32> to vector<4x8x8xf32>
    %45 = vector.extract_strided_slice %38 {offsets = [0, 0, 40], sizes = [4, 8, 8], strides = [1, 1, 1]} : vector<4x8x96xf32> to vector<4x8x8xf32>
    %46 = vector.extract_strided_slice %38 {offsets = [0, 0, 48], sizes = [4, 8, 8], strides = [1, 1, 1]} : vector<4x8x96xf32> to vector<4x8x8xf32>
    %47 = vector.extract_strided_slice %38 {offsets = [0, 0, 56], sizes = [4, 8, 8], strides = [1, 1, 1]} : vector<4x8x96xf32> to vector<4x8x8xf32>
    %48 = tpu.concatenate %44, %45, %46, %47 in 0 : vector<4x8x8xf32>, vector<4x8x8xf32>, vector<4x8x8xf32>, vector<4x8x8xf32> -> vector<16x8x8xf32>
    %49 = vector.extract_strided_slice %38 {offsets = [0, 0, 64], sizes = [4, 8, 8], strides = [1, 1, 1]} : vector<4x8x96xf32> to vector<4x8x8xf32>
    %50 = vector.extract_strided_slice %38 {offsets = [0, 0, 72], sizes = [4, 8, 8], strides = [1, 1, 1]} : vector<4x8x96xf32> to vector<4x8x8xf32>
    %51 = vector.extract_strided_slice %38 {offsets = [0, 0, 80], sizes = [4, 8, 8], strides = [1, 1, 1]} : vector<4x8x96xf32> to vector<4x8x8xf32>
    %52 = vector.extract_strided_slice %38 {offsets = [0, 0, 88], sizes = [4, 8, 8], strides = [1, 1, 1]} : vector<4x8x96xf32> to vector<4x8x8xf32>
    %53 = tpu.concatenate %49, %50, %51, %52 in 0 : vector<4x8x8xf32>, vector<4x8x8xf32>, vector<4x8x8xf32>, vector<4x8x8xf32> -> vector<16x8x8xf32>
    "tpu.trace_start"() <{level = 10 : i32, message = "gld,gmd->glm"}> : () -> ()
    %cst_19 = arith.constant dense<0.000000e+00> : vector<16x8x8xf32>
    %54 = tpu.matmul %43, %48, %cst_19 {dimension_numbers = #tpu.dot_dimension_numbers<[2], [2], [1], [1], [0, 0, 0, 1, 1, 1], [0], [0]>} : vector<16x8x8xf32>, vector<16x8x8xf32>, vector<16x8x8xf32> -> vector<16x8x8xf32>
    "tpu.trace_stop"() : () -> ()
    %cst_20 = arith.constant 0.353553385 : f32
    %55 = vector.broadcast %cst_20 : f32 to vector<16x8x8xf32>
    %56 = arith.mulf %54, %55 : vector<16x8x8xf32>
    %57 = tpu.iota {dimensions = array<i32: 0>} : vector<8x8xi32>
    %58 = tpu.iota {dimensions = array<i32: 1>} : vector<8x8xi32>
    %59 = arith.cmpi sle, %58, %57 : vector<8x8xi32>
    %cst_21 = arith.constant 0.000000e+00 : f32
    %cst_22 = arith.constant -1.000000e+30 : f32
    %60 = vector.broadcast %cst_21 : f32 to vector<8x8xf32>
    %61 = vector.broadcast %cst_22 : f32 to vector<8x8xf32>
    %62 = arith.select %59, %60, %61 : vector<8x8xi1>, vector<8x8xf32>
    %63 = vector.shape_cast %62 : vector<8x8xf32> to vector<1x8x8xf32>
    %64 = vector.broadcast %63 : vector<1x8x8xf32> to vector<16x8x8xf32>
    %65 = arith.addf %56, %64 : vector<16x8x8xf32>
    %cst_23 = arith.constant dense<0xFF800000> : vector<16x8xf32>
    %66 = vector.multi_reduction <maximumf>, %65, %cst_23 [2] : vector<16x8x8xf32> to vector<16x8xf32>
    %67 = vector.shape_cast %66 : vector<16x8xf32> to vector<16x8x1xf32>
    %68 = vector.broadcast %67 : vector<16x8x1xf32> to vector<16x8x8xf32>
    %69 = arith.subf %65, %68 : vector<16x8x8xf32>
    %70 = math.exp %69 : vector<16x8x8xf32>
    %cst_24 = arith.constant dense<0.000000e+00> : vector<16x8xf32>
    %71 = vector.multi_reduction <add>, %70, %cst_24 [2] : vector<16x8x8xf32> to vector<16x8xf32>
    %72 = vector.shape_cast %71 : vector<16x8xf32> to vector<16x8x1xf32>
    %73 = tpu.reciprocal %72 {approx = true} : vector<16x8x1xf32> -> vector<16x8x1xf32>
    %74 = vector.broadcast %73 : vector<16x8x1xf32> to vector<16x8x8xf32>
    %75 = arith.mulf %70, %74 : vector<16x8x8xf32>
    "tpu.trace_start"() <{level = 10 : i32, message = "glm,gmd->gld"}> : () -> ()
    %cst_25 = arith.constant dense<0.000000e+00> : vector<16x8x8xf32>
    %76 = tpu.matmul %75, %53, %cst_25 {dimension_numbers = #tpu.dot_dimension_numbers<[2], [1], [1], [2], [0, 0, 0, 1, 1, 2], [0], [0]>} : vector<16x8x8xf32>, vector<16x8x8xf32>, vector<16x8x8xf32> -> vector<16x8x8xf32>
    "tpu.trace_stop"() : () -> ()
    %77 = vector.extract_strided_slice %76 {offsets = [0, 0, 0], sizes = [4, 8, 8], strides = [1, 1, 1]} : vector<16x8x8xf32> to vector<4x8x8xf32>
    %78 = vector.extract_strided_slice %76 {offsets = [4, 0, 0], sizes = [4, 8, 8], strides = [1, 1, 1]} : vector<16x8x8xf32> to vector<4x8x8xf32>
    %79 = vector.extract_strided_slice %76 {offsets = [8, 0, 0], sizes = [4, 8, 8], strides = [1, 1, 1]} : vector<16x8x8xf32> to vector<4x8x8xf32>
    %80 = vector.extract_strided_slice %76 {offsets = [12, 0, 0], sizes = [4, 8, 8], strides = [1, 1, 1]} : vector<16x8x8xf32> to vector<4x8x8xf32>
    %81 = tpu.concatenate %77, %78, %79, %80 in 2 : vector<4x8x8xf32>, vector<4x8x8xf32>, vector<4x8x8xf32>, vector<4x8x8xf32> -> vector<4x8x32xf32>
    %82 = vector.shape_cast %81 : vector<4x8x32xf32> to vector<32x32xf32>
    %c0_26 = arith.constant 0 : index
    %c0_27 = arith.constant 0 : index
    %c0_28 = arith.constant 0 : index
    %83 = vector.load %arg8[%c0_26, %c0_27, %c0_28] : memref<1x32x32xbf16, #tpu.memory_space<vmem>>, vector<1x32x32xbf16>
    %84 = vector.shape_cast %83 : vector<1x32x32xbf16> to vector<32x32xbf16>
    %85 = arith.extf %84 : vector<32x32xbf16> to vector<32x32xf32>
    %cst_29 = arith.constant dense<0.000000e+00> : vector<32x32xf32>
    %86 = tpu.matmul %82, %85, %cst_29 {dimension_numbers = #tpu.dot_dimension_numbers<[1], [0], [0], [1], [0, 0, 1, 1], [], []>} : vector<32x32xf32>, vector<32x32xf32>, vector<32x32xf32> -> vector<32x32xf32>
    %87 = arith.addf %3, %86 : vector<32x32xf32>
    %c0_30 = arith.constant 0 : index
    %c0_31 = arith.constant 0 : index
    %c0_32 = arith.constant 0 : index
    %88 = vector.load %arg9[%c0_30, %c0_31, %c0_32] : memref<1x1x32xf32, #tpu.memory_space<vmem>>, vector<1x1x32xf32>
    %89 = vector.shape_cast %88 : vector<1x1x32xf32> to vector<1x32xf32>
    %90 = vector.broadcast %89 : vector<1x32xf32> to vector<32x32xf32>
    %91 = arith.addf %87, %90 : vector<32x32xf32>
    %c0_33 = arith.constant 0 : index
    %c0_34 = arith.constant 0 : index
    %c0_35 = arith.constant 0 : index
    %92 = vector.load %arg10[%c0_33, %c0_34, %c0_35] : memref<1x1x32xf32, #tpu.memory_space<vmem>>, vector<1x1x32xf32>
    %93 = vector.shape_cast %92 : vector<1x1x32xf32> to vector<1x32xf32>
    %c0_36 = arith.constant 0 : index
    %c0_37 = arith.constant 0 : index
    %c0_38 = arith.constant 0 : index
    %94 = vector.load %arg11[%c0_36, %c0_37, %c0_38] : memref<1x1x32xf32, #tpu.memory_space<vmem>>, vector<1x1x32xf32>
    %95 = vector.shape_cast %94 : vector<1x1x32xf32> to vector<1x32xf32>
    %cst_39 = arith.constant dense<0.000000e+00> : vector<32xf32>
    %96 = vector.multi_reduction <add>, %91, %cst_39 [1] : vector<32x32xf32> to vector<32xf32>
    %97 = vector.shape_cast %96 : vector<32xf32> to vector<32x1xf32>
    %cst_40 = arith.constant 3.200000e+01 : f32
    %98 = vector.broadcast %cst_40 : f32 to vector<32x1xf32>
    %99 = arith.divf %97, %98 : vector<32x1xf32>
    %100 = vector.broadcast %99 : vector<32x1xf32> to vector<32x32xf32>
    %101 = arith.subf %91, %100 : vector<32x32xf32>
    %102 = arith.mulf %101, %101 : vector<32x32xf32>
    %cst_41 = arith.constant dense<0.000000e+00> : vector<32xf32>
    %103 = vector.multi_reduction <add>, %102, %cst_41 [1] : vector<32x32xf32> to vector<32xf32>
    %104 = vector.shape_cast %103 : vector<32xf32> to vector<32x1xf32>
    %cst_42 = arith.constant 3.200000e+01 : f32
    %105 = vector.broadcast %cst_42 : f32 to vector<32x1xf32>
    %106 = arith.divf %104, %105 : vector<32x1xf32>
    %107 = vector.broadcast %99 : vector<32x1xf32> to vector<32x32xf32>
    %108 = arith.subf %91, %107 : vector<32x32xf32>
    %cst_43 = arith.constant 9.99999974E-6 : f32
    %109 = vector.broadcast %cst_43 : f32 to vector<32x1xf32>
    %110 = arith.addf %106, %109 : vector<32x1xf32>
    %111 = math.rsqrt %110 : vector<32x1xf32>
    %112 = vector.broadcast %111 : vector<32x1xf32> to vector<32x32xf32>
    %113 = arith.mulf %108, %112 : vector<32x32xf32>
    %114 = vector.broadcast %93 : vector<1x32xf32> to vector<32x32xf32>
    %115 = arith.mulf %113, %114 : vector<32x32xf32>
    %116 = vector.broadcast %95 : vector<1x32xf32> to vector<32x32xf32>
    %117 = arith.addf %115, %116 : vector<32x32xf32>
    %c0_44 = arith.constant 0 : index
    %c0_45 = arith.constant 0 : index
    %c0_46 = arith.constant 0 : index
    %118 = vector.load %arg12[%c0_44, %c0_45, %c0_46] : memref<1x32x128xbf16, #tpu.memory_space<vmem>>, vector<1x32x128xbf16>
    %119 = vector.shape_cast %118 : vector<1x32x128xbf16> to vector<32x128xbf16>
    %120 = arith.extf %119 : vector<32x128xbf16> to vector<32x128xf32>
    %cst_47 = arith.constant dense<0.000000e+00> : vector<32x128xf32>
    %121 = tpu.matmul %117, %120, %cst_47 {dimension_numbers = #tpu.dot_dimension_numbers<[1], [0], [0], [1], [0, 0, 1, 1], [], []>} : vector<32x32xf32>, vector<32x128xf32>, vector<32x128xf32> -> vector<32x128xf32>
    %c0_48 = arith.constant 0 : index
    %c0_49 = arith.constant 0 : index
    %c0_50 = arith.constant 0 : index
    %122 = vector.load %arg13[%c0_48, %c0_49, %c0_50] : memref<1x1x128xf32, #tpu.memory_space<vmem>>, vector<1x1x128xf32>
    %123 = vector.shape_cast %122 : vector<1x1x128xf32> to vector<1x128xf32>
    %124 = vector.broadcast %123 : vector<1x128xf32> to vector<32x128xf32>
    %125 = arith.addf %121, %124 : vector<32x128xf32>
    %cst_51 = arith.constant 1.702000e+00 : f32
    %126 = vector.broadcast %cst_51 : f32 to vector<32x128xf32>
    %127 = arith.mulf %126, %125 : vector<32x128xf32>
    %128 = arith.negf %127 : vector<32x128xf32>
    %129 = math.exp %128 : vector<32x128xf32>
    %cst_52 = arith.constant 1.000000e+00 : f32
    %130 = vector.broadcast %cst_52 : f32 to vector<32x128xf32>
    %131 = arith.addf %130, %129 : vector<32x128xf32>
    %132 = arith.divf %130, %131 : vector<32x128xf32>
    %133 = arith.mulf %125, %132 : vector<32x128xf32>
    %c0_53 = arith.constant 0 : index
    %c0_54 = arith.constant 0 : index
    %c0_55 = arith.constant 0 : index
    %134 = vector.load %arg14[%c0_53, %c0_54, %c0_55] : memref<1x128x32xbf16, #tpu.memory_space<vmem>>, vector<1x128x32xbf16>
    %135 = vector.shape_cast %134 : vector<1x128x32xbf16> to vector<128x32xbf16>
    %136 = arith.extf %135 : vector<128x32xbf16> to vector<128x32xf32>
    %cst_56 = arith.constant dense<0.000000e+00> : vector<32x32xf32>
    %137 = tpu.matmul %133, %136, %cst_56 {dimension_numbers = #tpu.dot_dimension_numbers<[1], [0], [0], [1], [0, 0, 1, 1], [], []>} : vector<32x128xf32>, vector<128x32xf32>, vector<32x32xf32> -> vector<32x32xf32>
    %138 = arith.addf %91, %137 : vector<32x32xf32>
    %c0_57 = arith.constant 0 : index
    %c0_58 = arith.constant 0 : index
    %c0_59 = arith.constant 0 : index
    %139 = vector.load %arg15[%c0_57, %c0_58, %c0_59] : memref<1x1x32xf32, #tpu.memory_space<vmem>>, vector<1x1x32xf32>
    %140 = vector.shape_cast %139 : vector<1x1x32xf32> to vector<1x32xf32>
    %141 = vector.broadcast %140 : vector<1x32xf32> to vector<32x32xf32>
    %142 = arith.addf %138, %141 : vector<32x32xf32>
    %c0_60 = arith.constant 0 : index
    %c0_61 = arith.constant 0 : index
    %143 = vector.load %arg20[%c0_60, %c0_61] : memref<32x32xf32, #tpu.memory_space<vmem>>, vector<32x32xf32>
    tpu.vector_store %arg20[%c0_60, %c0_61], %142 {strides = array<i32>} : memref<32x32xf32, #tpu.memory_space<vmem>>, vector<32x32xf32>,
    %c1_i32 = arith.constant 1 : i32
    %144 = arith.cmpi eq, %arg0, %c1_i32 : i32
    %145 = arith.extui %144 : i1 to i32
    %c0_i32_62 = arith.constant 0 : i32
    %146 = arith.cmpi ne, %145, %c0_i32_62 : i32
    scf.if %146 {
      %147 = tpu.iota {dimensions = array<i32: 1>} : vector<4x32xi32>
      %c0_63 = arith.constant 0 : index
      %c0_64 = arith.constant 0 : index
      %148 = vector.load %arg3[%c0_63, %c0_64] : memref<4x1xi32, #tpu.memory_space<vmem>>, vector<4x1xi32>
      %149 = vector.broadcast %148 : vector<4x1xi32> to vector<4x32xi32>
      %150 = arith.cmpi eq, %147, %149 : vector<4x32xi32>
      %151 = arith.extui %150 : vector<4x32xi1> to vector<4x32xi32>
      %152 = arith.sitofp %151 : vector<4x32xi32> to vector<4x32xf32>
      %c0_65 = arith.constant 0 : index
      %c0_66 = arith.constant 0 : index
      %153 = vector.load %arg20[%c0_65, %c0_66] : memref<32x32xf32, #tpu.memory_space<vmem>>, vector<32x32xf32>
      %cst_67 = arith.constant dense<0.000000e+00> : vector<4x32xf32>
      %154 = tpu.matmul %152, %153, %cst_67 {dimension_numbers = #tpu.dot_dimension_numbers<[1], [0], [0], [1], [0, 0, 1, 1], [], []>} : vector<4x32xf32>, vector<32x32xf32>, vector<4x32xf32> -> vector<4x32xf32>
      %c0_68 = arith.constant 0 : index
      %c0_69 = arith.constant 0 : index
      %155 = vector.load %arg16[%c0_68, %c0_69] : memref<1x32xf32, #tpu.memory_space<vmem>>, vector<1x32xf32>
      %c0_70 = arith.constant 0 : index
      %c0_71 = arith.constant 0 : index
      %156 = vector.load %arg17[%c0_70, %c0_71] : memref<1x32xf32, #tpu.memory_space<vmem>>, vector<1x32xf32>
      %cst_72 = arith.constant dense<0.000000e+00> : vector<4xf32>
      %157 = vector.multi_reduction <add>, %154, %cst_72 [1] : vector<4x32xf32> to vector<4xf32>
      %158 = vector.shape_cast %157 : vector<4xf32> to vector<4x1xf32>
      %cst_73 = arith.constant 3.200000e+01 : f32
      %159 = vector.broadcast %cst_73 : f32 to vector<4x1xf32>
      %160 = arith.divf %158, %159 : vector<4x1xf32>
      %161 = vector.broadcast %160 : vector<4x1xf32> to vector<4x32xf32>
      %162 = arith.subf %154, %161 : vector<4x32xf32>
      %163 = arith.mulf %162, %162 : vector<4x32xf32>
      %cst_74 = arith.constant dense<0.000000e+00> : vector<4xf32>
      %164 = vector.multi_reduction <add>, %163, %cst_74 [1] : vector<4x32xf32> to vector<4xf32>
      %165 = vector.shape_cast %164 : vector<4xf32> to vector<4x1xf32>
      %cst_75 = arith.constant 3.200000e+01 : f32
      %166 = vector.broadcast %cst_75 : f32 to vector<4x1xf32>
      %167 = arith.divf %165, %166 : vector<4x1xf32>
      %168 = vector.broadcast %160 : vector<4x1xf32> to vector<4x32xf32>
      %169 = arith.subf %154, %168 : vector<4x32xf32>
      %cst_76 = arith.constant 9.99999974E-6 : f32
      %170 = vector.broadcast %cst_76 : f32 to vector<4x1xf32>
      %171 = arith.addf %167, %170 : vector<4x1xf32>
      %172 = math.rsqrt %171 : vector<4x1xf32>
      %173 = vector.broadcast %172 : vector<4x1xf32> to vector<4x32xf32>
      %174 = arith.mulf %169, %173 : vector<4x32xf32>
      %175 = vector.broadcast %155 : vector<1x32xf32> to vector<4x32xf32>
      %176 = arith.mulf %174, %175 : vector<4x32xf32>
      %177 = vector.broadcast %156 : vector<1x32xf32> to vector<4x32xf32>
      %178 = arith.addf %176, %177 : vector<4x32xf32>
      %c0_77 = arith.constant 0 : index
      %c0_78 = arith.constant 0 : index
      %179 = vector.load %arg18[%c0_77, %c0_78] : memref<32x128xf32, #tpu.memory_space<vmem>>, vector<32x128xf32>
      %cst_79 = arith.constant dense<0.000000e+00> : vector<4x128xf32>
      %180 = tpu.matmul %178, %179, %cst_79 {dimension_numbers = #tpu.dot_dimension_numbers<[1], [0], [0], [1], [0, 0, 1, 1], [], []>} : vector<4x32xf32>, vector<32x128xf32>, vector<4x128xf32> -> vector<4x128xf32>
      %c0_80 = arith.constant 0 : index
      %c0_81 = arith.constant 0 : index
      %181 = vector.load %arg19[%c0_80, %c0_81] : memref<4x128xf32, #tpu.memory_space<vmem>>, vector<4x128xf32>
      tpu.vector_store %arg19[%c0_80, %c0_81], %180 {strides = array<i32>} : memref<4x128xf32, #tpu.memory_space<vmem>>, vector<4x128xf32>,
    } else {
    }
    return
  }
  func.func @transform_0(%arg0: i32) -> (i32, i32) {
    %c0_i32 = arith.constant 0 : i32
    %c0_i32_0 = arith.constant 0 : i32
    %c0_i32_1 = arith.constant 0 : i32
    return %c0_i32, %c0_i32_0 : i32, i32
  }
  func.func @transform_1(%arg0: i32) -> (i32, i32) {
    %c0_i32 = arith.constant 0 : i32
    %c0_i32_0 = arith.constant 0 : i32
    %c0_i32_1 = arith.constant 0 : i32
    return %c0_i32, %c0_i32_0 : i32, i32
  }
  func.func @transform_2(%arg0: i32) -> (i32, i32) {
    %c0_i32 = arith.constant 0 : i32
    %c0_i32_0 = arith.constant 0 : i32
    %c0_i32_1 = arith.constant 0 : i32
    return %c0_i32, %c0_i32_0 : i32, i32
  }
  func.func @transform_3(%arg0: i32) -> (i32, i32, i32) {
    %c0_i32 = arith.constant 0 : i32
    %c0_i32_0 = arith.constant 0 : i32
    %c0_i32_1 = arith.constant 0 : i32
    return %arg0, %c0_i32, %c0_i32_0 : i32, i32, i32
  }
  func.func @transform_4(%arg0: i32) -> (i32, i32, i32) {
    %c0_i32 = arith.constant 0 : i32
    %c0_i32_0 = arith.constant 0 : i32
    %c0_i32_1 = arith.constant 0 : i32
    return %arg0, %c0_i32, %c0_i32_0 : i32, i32, i32
  }
  func.func @transform_5(%arg0: i32) -> (i32, i32, i32) {
    %c0_i32 = arith.constant 0 : i32
    %c0_i32_0 = arith.constant 0 : i32
    %c0_i32_1 = arith.constant 0 : i32
    return %arg0, %c0_i32, %c0_i32_0 : i32, i32, i32
  }
  func.func @transform_6(%arg0: i32) -> (i32, i32, i32) {
    %c0_i32 = arith.constant 0 : i32
    %c0_i32_0 = arith.constant 0 : i32
    %c0_i32_1 = arith.constant 0 : i32
    return %arg0, %c0_i32, %c0_i32_0 : i32, i32, i32
  }
  func.func @transform_7(%arg0: i32) -> (i32, i32, i32) {
    %c0_i32 = arith.constant 0 : i32
    %c0_i32_0 = arith.constant 0 : i32
    %c0_i32_1 = arith.constant 0 : i32
    return %arg0, %c0_i32, %c0_i32_0 : i32, i32, i32
  }
  func.func @transform_8(%arg0: i32) -> (i32, i32, i32) {
    %c0_i32 = arith.constant 0 : i32
    %c0_i32_0 = arith.constant 0 : i32
    %c0_i32_1 = arith.constant 0 : i32
    return %arg0, %c0_i32, %c0_i32_0 : i32, i32, i32
  }
  func.func @transform_9(%arg0: i32) -> (i32, i32, i32) {
    %c0_i32 = arith.constant 0 : i32
    %c0_i32_0 = arith.constant 0 : i32
    %c0_i32_1 = arith.constant 0 : i32
    return %arg0, %c0_i32, %c0_i32_0 : i32, i32, i32
  }
  func.func @transform_10(%arg0: i32) -> (i32, i32, i32) {
    %c0_i32 = arith.constant 0 : i32
    %c0_i32_0 = arith.constant 0 : i32
    %c0_i32_1 = arith.constant 0 : i32
    return %arg0, %c0_i32, %c0_i32_0 : i32, i32, i32
  }
  func.func @transform_11(%arg0: i32) -> (i32, i32, i32) {
    %c0_i32 = arith.constant 0 : i32
    %c0_i32_0 = arith.constant 0 : i32
    %c0_i32_1 = arith.constant 0 : i32
    return %arg0, %c0_i32, %c0_i32_0 : i32, i32, i32
  }
  func.func @transform_12(%arg0: i32) -> (i32, i32, i32) {
    %c0_i32 = arith.constant 0 : i32
    %c0_i32_0 = arith.constant 0 : i32
    %c0_i32_1 = arith.constant 0 : i32
    return %arg0, %c0_i32, %c0_i32_0 : i32, i32, i32
  }
  func.func @transform_13(%arg0: i32) -> (i32, i32, i32) {
    %c0_i32 = arith.constant 0 : i32
    %c0_i32_0 = arith.constant 0 : i32
    %c0_i32_1 = arith.constant 0 : i32
    return %arg0, %c0_i32, %c0_i32_0 : i32, i32, i32
  }
  func.func @transform_14(%arg0: i32) -> (i32, i32, i32) {
    %c0_i32 = arith.constant 0 : i32
    %c0_i32_0 = arith.constant 0 : i32
    %c0_i32_1 = arith.constant 0 : i32
    return %arg0, %c0_i32, %c0_i32_0 : i32, i32, i32
  }
  func.func @transform_15(%arg0: i32) -> (i32, i32) {
    %c0_i32 = arith.constant 0 : i32
    %c0_i32_0 = arith.constant 0 : i32
    %c0_i32_1 = arith.constant 0 : i32
    return %c0_i32, %c0_i32_0 : i32, i32
  }
  func.func @transform_16(%arg0: i32) -> (i32, i32) {
    %c0_i32 = arith.constant 0 : i32
    %c0_i32_0 = arith.constant 0 : i32
    %c0_i32_1 = arith.constant 0 : i32
    return %c0_i32, %c0_i32_0 : i32, i32
  }
  func.func @transform_17(%arg0: i32) -> (i32, i32) {
    %c0_i32 = arith.constant 0 : i32
    %c0_i32_0 = arith.constant 0 : i32
    %c0_i32_1 = arith.constant 0 : i32
    return %c0_i32, %c0_i32_0 : i32, i32
  }
  func.func @transform_18(%arg0: i32) -> (i32, i32) {
    %c0_i32 = arith.constant 0 : i32
    %c0_i32_0 = arith.constant 0 : i32
    %c0_i32_1 = arith.constant 0 : i32
    return %c0_i32, %c0_i32_0 : i32, i32
  }
}

</mosaic_0001>

<bundles_post_ra>
// kernel: tpu_custom_call.1
= control target key start
LH: loop header
LB: loop body
LE: loop exit
PB: predicated region body
PF: predicated region fallthrough
CT: control target
= control target key end

     0   :  { %s6118_s0 = inlined_call_operand.vmem [shape: f32[32,32], index: 0, kind: input, shape index: {}]   ;;  %s6119_s1 = inlined_call_operand.hbm [shape: f32[8,32], index: 1, kind: input, shape index: {}]   ;;  %s6120_s2 = inlined_call_operand.vmem [shape: s32[4,1], index: 2, kind: input, shape index: {}]   ;;  %s6121_s3 = inlined_call_operand.vmem [shape: f32[2,1,32], index: 3, kind: input, shape index: {}]   ;;  %s6122_s4 = inlined_call_operand.vmem [shape: f32[2,1,32], index: 4, kind: input, shape index: {}]   ;;  %s6123_s5 = inlined_call_operand.vmem [shape: bf16[2,32,96], index: 5, kind: input, shape index: {}]   ;;  %s6124_s6 = inlined_call_operand.vmem [shape: f32[2,1,96], index: 6, kind: input, shape index: {}]   ;;  %s6125_s7 = inlined_call_operand.vmem [shape: bf16[2,32,32], index: 7, kind: input, shape index: {}]   ;;  %s6126_s8 = inlined_call_operand.vmem [shape: f32[2,1,32], index: 8, kind: input, shape index: {}]   ;;  %s6127_s9 = inlined_call_operand.vmem [shape: f32[2,1,32], index: 9, kind: input, shape index: {}]   ;;  %s6128_s10 = inlined_call_operand.vmem [shape: f32[2,1,32], index: 10, kind: input, shape index: {}]   ;;  %s6129_s11 = inlined_call_operand.vmem [shape: bf16[2,32,128], index: 11, kind: input, shape index: {}]   ;;  %s6130_s12 = inlined_call_operand.vmem [shape: f32[2,1,128], index: 12, kind: input, shape index: {}]   ;;  %s6131_s13 = inlined_call_operand.vmem [shape: bf16[2,128,32], index: 13, kind: input, shape index: {}]   ;;  %s6132_s14 = inlined_call_operand.vmem [shape: f32[2,1,32], index: 14, kind: input, shape index: {}]   ;;  %s6133_s15 = inlined_call_operand.vmem [shape: f32[1,32], index: 15, kind: input, shape index: {}]   ;;  %s6134_s16 = inlined_call_operand.vmem [shape: f32[1,32], index: 16, kind: input, shape index: {}]   ;;  %s6135_s17 = inlined_call_operand.vmem [shape: f32[32,128], index: 17, kind: input, shape index: {}]   ;;  %s6136_s18 = inlined_call_operand.hbm [shape: f32[4,128], index: 18, kind: output, shape index: {}]  }
   0x1   :  { %6140 = sst [smem:[#allocation10_spill]] %s6118_s0 }
   0x2   :  { %6141 = sst [smem:[#allocation11_spill]] %s6119_s1 }
   0x3   :  { %6142 = sst [smem:[#allocation12_spill]] %s6120_s2 }
   0x4   :  { %6143 = sst [smem:[#allocation13_spill]] %s6123_s5 }
   0x5   :  { %6144 = sst [smem:[#allocation14_spill]] %s6125_s7 }
   0x6   :  { %6145 = sst [smem:[#allocation15_spill]] %s6133_s15 }
   0x7   :  { %6146 = sst [smem:[#allocation16_spill]] %s6134_s16 }
   0x8   :  { %6147 = sst [smem:[#allocation17_spill]] %s6135_s17 }
   0x9   :  { %6148 = sst [smem:[#allocation18_spill]] %s6136_s18 }
   0xa   :  { %23 = vsyncpa [#allocation4], 0 }
   0xb   :  { %24 = vsyncpa [#allocation5], 0  ;;  %s5397_s27 = smov 0  }
   0xc LB: > { %6149 = sst [smem:[#allocation9_spill]] %s5284_s27  ;;  %s5403_s28 = sadd.s32 4294967295, %s5284_s27   ;;  %s5284_s27 = sphi %s5397_s27, %s30_s27  }
   0xd   : > { %p4531_p0 = scmp.ge.s32.totalorder %s5284_s27, 1  ;;  %p494_p1 = scmp.lt.s32.totalorder %s5284_s27, 3 }
   0xe   : > { %p4532_p2 = scmp.ne.s32.totalorder %s5403_s28, 0  ;;  %p5089_p4 = scmp.eq.s32.totalorder %s5403_s28, 0 }
   0xf   : > { %p5408_p3 = pnand %p4531_p0, %p494_p1  ;;  %s5286_s30 = smov [#allocation3]  }
  0x10   : > { %s510_s0 = sshll.u32 %s5286_s30, 4  ;;  %s511_s0 = int_to_ptr.vmem [resolvable:$true] %s510_s0 }
  0x11   : > { %p5085_p5 = pneg %p5408_p3  ;;  %s5231_s19 = scalar_lea.vmem %s511_s0, 128 }
  0x12   : > { %p5232_p8 = scmp.ne.s32.totalorder %s511_s0, %s5231_s19  ;;  %p5239_p11 = scmp.lt.s32.totalorder %s511_s0, %s511_s0 }
  0x13   : > { %p5086_p6 = pnand %p5089_p4, %p5085_p5  ;;  %p5240_p12 = scmp.lt.s32.totalorder %s5231_s19, %s5231_s19 }
  0x15   : > { %p5222_p7 = pneg %p5086_p6  ;;  %p5241_p13 = por %p5240_p12, %p5239_p11 }
  0x17   : > { %p5234_p9 = pnand %p5232_p8, %p5222_p7 }
  0x19   : > { %p5235_p10 = pneg %p5234_p9 }
  0x1b   : > { %p5242_p0 = pnand %p5241_p13, %p5235_p10 }
  0x1d   : > { %5245 = shalt.err (!%p5242_p0)
}
  0x1e   : > { %s6151_s21 = sld [smem:[#allocation11_spill]] }
  0x20   : > { %615 = sbr.rel (%p5408_p3) target bundleno = 3512 (0xdb8), region = 92 }
  0x24   : > { %5088 = dma.hbm_to_vmem [thread:$0]  (!%p5086_p6), %s6151_s21, 128, %s511_s0, [#allocation4]  }
  0x25   : > { %5275 = dma.done.wait (%p5089_p4), [#allocation4], 128  }
  0x26   : > { %5277 = vsyncadd (%p5089_p4), [#allocation4], 4294967168  ;;  %p703_p1 = scmp.lt.s32.totalorder %s5403_s28, 1  ;;  %s6152_s5 = sld [smem:[#allocation13_spill]] }
  0x27   : > { %s6153_s7 = sld [smem:[#allocation14_spill]] }
  0x28   : > { %s5428_s22 = scalar_select %p703_p1, %s5403_s28, 1 }
  0x29   : > { %s6154_s20 = sld [smem:[#allocation10_spill]] (!%p4532_p2) }
  0x2a   : > { %s4627_s30 = sshll.u32 %s5428_s22, 4  ;;  %s727_s15 = scalar_lea.vmem %s6127_s9, %s5428_s22 }
  0x2b   : > { %s730_s1 = scalar_lea.vmem %s6128_s10, %s5428_s22  ;;  %s4630_s17 = sshll.u32 %s5428_s22, 6 }
  0x2c   : > { %s5446_s2 = scalar_lea.vmem %s6152_s5, %s4627_s30  ;;  %s5468_s5 = scalar_lea.vmem %s6129_s11, %s4627_s30 }
  0x2d   : > { %s5451_s18 = scalar_lea.vmem %s6153_s7, %s4627_s30  ;;  %s738_s7 = scalar_lea.vmem %s6130_s12, %s5428_s22 }
  0x2e   : > { %s5478_s25 = scalar_lea.vmem %s6131_s13, %s4630_s17  ;;  %s746_s0 = scalar_lea.vmem %s6132_s14, %s5428_s22 }
  0x2f   : > { %750 = sbr.rel (%p4532_p2) target bundleno = 57 (0x39), region = 100 }
  0x34   : > { %v751_v0 = vld [vmem:[#allocation3] sm:$0xff]  ;;  %vm760_vm0 = vcmask 261120   ;;  %v753_v2 = vld [vmem:[%s6154_s20 + $0x8] sm:$0xff]  ;;  %v754_v5 = vld [vmem:[%s6154_s20 + $0x10] sm:$0xff] }
  0x35   : > { %v752_v1 = vld [vmem:[%s6154_s20] sm:$0xff]  ;;  %v757_v4 = vadd.f32 %v753_v2, %v751_v0  ;;  %v755_v6 = vld [vmem:[%s6154_s20 + $0x18] sm:$0xff]  ;;  %v758_v7 = vadd.f32 %v754_v5, %v751_v0 }
  0x36   : > { %v756_v3 = vadd.f32 %v752_v1, %v751_v0  ;;  %v759_v8 = vadd.f32 %v755_v6, %v751_v0 }
  0x37   : > { %762 = vst.msk [vmem:[#allocation2 + $0x8] sm:$0xff] %vm760_vm0, %v757_v4  ;;  %763 = vst.msk [vmem:[#allocation2 + $0x10] sm:$0xff] %vm760_vm0, %v758_v7 }
  0x38   : > { %761 = vst.msk [vmem:[#allocation2] sm:$0xff] %vm760_vm0, %v756_v3  ;;  %764 = vst.msk [vmem:[#allocation2 + $0x18] sm:$0xff] %vm760_vm0, %v759_v8 }
  0x39 PF: > { %vm771_vm1 = vcmask 261120   ;;  %v4687_v37 = vld [vmem:[%s5446_s2 + $0x8] sm:$0xff]   ;;  %v4632_v38 = vld [vmem:[%s5446_s2] sm:$0xff]   ;;  %s6155_s26 = scalar_lea.vmem %s6121_s3, %s5428_s22  ;;  %s6156_s21 = scalar_lea.vmem %s6122_s4, %s5428_s22  ;;  %vm5290_vm2 = vmmov 0   ;;  %vm987_vm3 = vcmask 64512   ;;  %vm3684_vm5 = vcmask 130048  }
  0x3a   : > { %v4637_v39 = vunpack.c.l.bf16 %v4687_v37  ;;  %v4638_v40 = vunpack.c.h.bf16 %v4687_v37  ;;  %v4634_v41 = vunpack.c.h.bf16 %v4632_v38  ;;  %v4633_v42 = vunpack.c.l.bf16 %v4632_v38  ;;  %v4545_v56 = vld [vmem:[%s6155_s26] ss:$0 sm:$0xff]  ;;  %s6157_s23 = scalar_lea.vmem %s6124_s6, %s5428_s22  ;;  %s5287_s16 = smov 120  }
  0x3b   : > { %v4546_v58 = vld [vmem:[%s6156_s21] ss:$0 sm:$0xff]  ;;  %s5288_s24 = smov 112   ;;  %s5291_s2 = smov 104   ;;  %vm3689_vm6 = vcmask 195584  }
  0x3c   : > { %4815 = vmatprep.subr.mxu0 %v4638_v40  ;;  %s5292_s29 = smov 96   ;;  %s5293_s26 = smov 64  }
  0x3d   : > { %4816 = vmatpush3.msra.mxu0 %v4638_v40  ;;  %s5295_s30 = smov 8   ;;  %s5296_s19 = smov 16  }
  0x3e   : > { %v767_v10 = vld [vmem:[#allocation2 + $0x10] sm:$0xff]  ;;  %v766_v11 = vld [vmem:[#allocation2 + $0x8] sm:$0xff]  ;;  %4817 = vmatprep.subr.mxu0 %v4637_v39  ;;  %s5297_s21 = smov 24   ;;  %s6158_s17 = scalar_lea.vmem %s6126_s8, %s5428_s22 }
  0x3f   : > { %v765_v9 = vld [vmem:[#allocation2] sm:$0xff]  ;;  %v778_v13 = vsel %vm771_vm1, %v767_v10, 0.0  ;;  %v768_v14 = vld [vmem:[#allocation2 + $0x18] sm:$0xff]  ;;  %v775_v15 = vsel %vm771_vm1, %v766_v11, 0.0  ;;  %4818 = vmatpush3.msra.mxu0 %v4637_v39  ;;  %p4617_p2 = scmp.ne.s32.totalorder %s5403_s28, 1 }
  0x40   : > { %v772_v12 = vsel %vm771_vm1, %v765_v9, 0.0  ;;  %779 = vadd.xlane.f32.xlu1 %v778_v13  ;;  %v781_v16 = vsel %vm771_vm1, %v768_v14, 0.0  ;;  %4819 = vmatprep.subr.mxu0 %v4634_v41 }
  0x41   : > { %773 = vadd.xlane.f32.xlu0 %v772_v12  ;;  %4820 = vmatpush3.msra.mxu0 %v4634_v41 }
  0x42   : > { %4821 = vmatprep.subr.mxu0 %v4633_v42 }
  0x43   : > { %4822 = vmatpush3.msra.mxu0 %v4633_v42 }
  0x44   : > { %782 = vadd.xlane.f32.xlu1 %v781_v16 }
  0x45   : > { %776 = vadd.xlane.f32.xlu0 %v775_v15 }
  0xc9   : > { %v780_v18 = vpop.xlane.xlu1 %779 }
  0xca   : > { %v774_v17 = vpop.xlane.xlu0 %773  ;;  %v787_v20 = vmul.f32 0.03125, %v780_v18 }
  0xcb   : > { %v785_v19 = vmul.f32 0.03125, %v774_v17  ;;  %v5289_v17 = vmov 0.0  }
  0xcc   : > { %v791_v22 = vsub.f32 %v767_v10, %v787_v20  ;;  %4829 = vmatprep.subr.mxu0 %v5289_v17  ;;  %4834 = vmatprep.subr.mxu1 %v5289_v17 }
  0xcd   : > { %v789_v21 = vsub.f32 %v765_v9, %v785_v19  ;;  %v783_v24 = vpop.xlane.xlu1 %782  ;;  %v4547_v9 = vld [vmem:[%s6157_s23] ss:$0 sm:$0xff]  ;;  %4836 = vmatprep.mubr.msk.f32.mxu1 %vm5290_vm2, %v5289_v17 }
  0xce   : > { %v777_v23 = vpop.xlane.xlu0 %776  ;;  %v788_v26 = vmul.f32 0.03125, %v783_v24  ;;  %v795_v28 = vmul.f32 %v791_v22, %v791_v22 }
  0xcf   : > { %v786_v25 = vmul.f32 0.03125, %v777_v23  ;;  %v793_v27 = vmul.f32 %v789_v21, %v789_v21 }
  0xd0   : > { %v792_v30 = vsub.f32 %v768_v14, %v788_v26  ;;  %v803_v32 = vsel %vm771_vm1, %v795_v28, 0.0 }
  0xd1   : > { %v790_v29 = vsub.f32 %v766_v11, %v786_v25  ;;  %v797_v31 = vsel %vm771_vm1, %v793_v27, 0.0 }
  0xd2   : > { %798 = vadd.xlane.f32.xlu0 %v797_v31  ;;  %v796_v34 = vmul.f32 %v792_v30, %v792_v30 }
  0xd3   : > { %v794_v33 = vmul.f32 %v790_v29, %v790_v29 }
  0xd4   : > { %v806_v36 = vsel %vm771_vm1, %v796_v34, 0.0 }
  0xd5   : > { %v800_v35 = vsel %vm771_vm1, %v794_v33, 0.0 }
  0xd6   : > { %804 = vadd.xlane.f32.xlu0 %v803_v32  ;;  %801 = vadd.xlane.f32.xlu1 %v800_v35 }
  0xda   : > { %807 = vadd.xlane.f32.xlu1 %v806_v36 }
 0x15b   : > { %v799_v43 = vpop.xlane.xlu0 %798 }
 0x15c   : > { %v809_v44 = vmul.f32 0.03125, %v799_v43 }
 0x15e   : > { %v813_v45 = vadd.f32 1e-05, %v809_v44 }
 0x15f   : > { %v802_v46 = vpop.xlane.xlu1 %801  ;;  %v805_v47 = vpop.xlane.xlu0 %804 }
 0x160   : > { %5117 = vrsqrt.f32 %v813_v45  ;;  %v810_v48 = vmul.f32 0.03125, %v802_v46  ;;  %v811_v49 = vmul.f32 0.03125, %v805_v47 }
 0x162   : > { %v814_v50 = vadd.f32 1e-05, %v810_v48  ;;  %v815_v51 = vadd.f32 1e-05, %v811_v49  ;;  %v2218_v48 = vlaneseq }
 0x163   : > { %v808_v52 = vpop.xlane.xlu1 %807 }
 0x164   : > { %5119 = vrsqrt.f32 %v814_v50  ;;  %v812_v53 = vmul.f32 0.03125, %v808_v52  ;;  %v2219_v49 = vshrl.u32 %v2218_v48, 7  ;;  %v5700_v50 = vand.u32 127, %v2218_v48 }
 0x165   : > { %5121 = vrsqrt.f32 %v815_v51  ;;  %v5294_v52 = vmov -1e+30  }
 0x166   : > { %v816_v54 = vadd.f32 1e-05, %v812_v53  ;;  %vm2222_vm4 = vcmp.le.s32.totalorder %v5700_v50, %v2219_v49 }
 0x167   : > { %v5703_v53 = vsel %vm2222_vm4, 0.0, %v5294_v52 }
 0x168   : > { %5123 = vrsqrt.f32 %v816_v54 }
 0x16d   : > { %v5118_v55 = vpop.eup %5117 }
 0x16e   : > { %v821_v57 = vmul.f32 %v5118_v55, %v789_v21 }
 0x170   : > { %v831_v59 = vmul.f32 %v4545_v56, %v821_v57 }
 0x171   : > { %v5120_v60 = vpop.eup %5119 }
 0x172   : > { %v5122_v61 = vpop.eup %5121  ;;  %v841_v62 = vadd.f32 %v4546_v58, %v831_v59  ;;  %v822_v63 = vmul.f32 %v5120_v60, %v790_v29 }
 0x173   : > { %v823_v0 = vmul.f32 %v5122_v61, %v791_v22 }
 0x174   : > { %4823 = vmatprep.mubr.msk.f32.mxu0 %vm771_vm1, %v841_v62  ;;  %v832_v1 = vmul.f32 %v4545_v56, %v822_v63 }
 0x175   : > { %v5124_v2 = vpop.eup %5123  ;;  %v833_v3 = vmul.f32 %v4545_v56, %v823_v0 }
 0x176   : > { %v842_v4 = vadd.f32 %v4546_v58, %v832_v1  ;;  %v824_v5 = vmul.f32 %v5124_v2, %v792_v30 }
 0x177   : > { %v843_v6 = vadd.f32 %v4546_v58, %v833_v3 }
 0x178   : > { %4824 = vmatmul.mubr.msk.f32.vlgmr.msra.gmra.mxu0 %vm771_vm1, %v842_v4  ;;  %v834_v7 = vmul.f32 %v4545_v56, %v824_v5 }
 0x179   : > { %4826 = vmatprep.mubr.msk.f32.mxu0 %vm771_vm1, %v843_v6 }
 0x17a   : > { %v844_v8 = vadd.f32 %v4546_v58, %v834_v7 }
 0x17c   : > { %4827 = vmatmul.mubr.msk.f32.gmra.mxu0 %vm771_vm1, %v844_v8 }
 0x17d   : > { %4831 = vmatprep.mubr.msk.f32.mxu0 %vm5290_vm2, %v5289_v17 }
 0x238   : > { %v4825_v10 = vpop.f32.mrf.mxu0 }
 0x239   : > { %v5527_v11 = vadd.f32 %v4825_v10, %v4547_v9 }
 0x23a   : > { %v938_v12 = vpop.f32.mrf.mxu0 }
 0x23b   : > { %v939_v13 = vadd.f32 %v4547_v9, %v938_v12  ;;  %963 = vrot.lane.b32.xlu1 %v5527_v11, %s5287_s16 }
 0x23c   : > { %v4828_v14 = vpop.f32.mrf.mxu0 }
 0x23d   : > { %961 = vrot.lane.b32.xlu0 %v939_v13, %s5287_s16  ;;  %v5535_v18 = vadd.f32 %v4828_v14, %v4547_v9 }
 0x23e   : > { %v948_v15 = vpop.f32.mrf.mxu0 }
 0x23f   : > { %v5530_v16 = vadd.f32 %v4547_v9, %v948_v15 }
 0x241   : > { %969 = vrot.lane.b32.xlu0 %v939_v13, %s5288_s24  ;;  %965 = vrot.lane.b32.xlu1 %v5530_v16, %s5287_s16 }
 0x245   : > { %973 = vrot.lane.b32.xlu0 %v5530_v16, %s5288_s24  ;;  %967 = vrot.lane.b32.xlu1 %v5535_v18, %s5287_s16 }
 0x249   : > { %977 = vrot.lane.b32.xlu0 %v939_v13, %s5291_s2  ;;  %971 = vrot.lane.b32.xlu1 %v5527_v11, %s5288_s24 }
 0x24d   : > { %981 = vrot.lane.b32.xlu0 %v5530_v16, %s5291_s2  ;;  %975 = vrot.lane.b32.xlu1 %v5535_v18, %s5288_s24  ;;  %s6161_s24 = sld [smem:[#allocation15_spill]] (!%p4617_p2) }
 0x251   : > { %985 = vrot.lane.b32.xlu0 %v939_v13, %s5292_s29  ;;  %979 = vrot.lane.b32.xlu1 %v5527_v11, %s5291_s2 }
 0x255   : > { %1138 = vrot.lane.b32.xlu0 %v5530_v16, %s5292_s29  ;;  %983 = vrot.lane.b32.xlu1 %v5535_v18, %s5291_s2  ;;  %s6159_s2 = sld [smem:[#allocation12_spill]] (!%p4617_p2) }
 0x259   : > { %1062 = vrot.lane.b32.xlu1 %v5527_v11, %s5292_s29 }
 0x25d   : > { %1214 = vrot.lane.b32.xlu1 %v5535_v18, %s5292_s29 }
 0x2ad   : > { %v5555_v19 = vpop.permute.xlu1 %963 }
 0x2ae   : > { %1366 = vrot.lane.b32.xlu1 %v5555_v19, %s5292_s29 }
 0x2af   : > { %v5559_v20 = vpop.permute.xlu0 %961 }
 0x2b0   : > { %1290 = vrot.lane.b32.xlu0 %v5559_v20, %s5292_s29 }
 0x2b3   : > { %v5563_v21 = vpop.permute.xlu1 %965  ;;  %v5565_v22 = vpop.permute.xlu0 %969 }
 0x2b4   : > { %1442 = vrot.lane.b32.xlu0 %v5563_v21, %s5292_s29 }
 0x2b7   : > { %v5569_v23 = vpop.permute.xlu1 %967  ;;  %v5571_v24 = vpop.permute.xlu0 %973 }
 0x2b8   : > { %1518 = vrot.lane.b32.xlu1 %v5569_v23, %s5292_s29  ;;  %1594 = vrot.lane.b32.xlu0 %v5565_v22, %s5292_s29 }
 0x2bb   : > { %v5577_v25 = vpop.permute.xlu1 %971  ;;  %v5579_v26 = vpop.permute.xlu0 %977 }
 0x2bc   : > { %1670 = vrot.lane.b32.xlu1 %v5577_v25, %s5292_s29  ;;  %1746 = vrot.lane.b32.xlu0 %v5571_v24, %s5292_s29 }
 0x2bf   : > { %v5585_v27 = vpop.permute.xlu1 %975  ;;  %v5587_v28 = vpop.permute.xlu0 %981 }
 0x2c0   : > { %1822 = vrot.lane.b32.xlu1 %v5585_v27, %s5292_s29  ;;  %1898 = vrot.lane.b32.xlu0 %v5579_v26, %s5292_s29 }
 0x2c3   : > { %v5593_v29 = vpop.permute.xlu1 %979  ;;  %v986_v30 = vpop.permute.xlu0 %985 }
 0x2c4   : > { %1974 = vrot.lane.b32.xlu1 %v5593_v29, %s5292_s29  ;;  %2050 = vrot.lane.b32.xlu0 %v5587_v28, %s5292_s29 }
 0x2c5   : > { %4830 = vmatpush3.xpose.msk.msra.mxu0 %vm987_vm3, %v986_v30 }
 0x2c6   : > { %4844 = vmatprep.subr.mxu0 %v5289_v17 }
 0x2c7   : > { %v5601_v31 = vpop.permute.xlu1 %983  ;;  %v1139_v33 = vpop.permute.xlu0 %1138 }
 0x2c8   : > { %4832 = vmatmul.mubr.msk.f32.vlgmr.msra.gmra.mxu0 %vm987_vm3, %v939_v13  ;;  %2126 = vrot.lane.b32.xlu1 %v5601_v31, %s5292_s29 }
 0x2c9   : > { %2416 = vrot.lane.b32.xlu0 %v939_v13, %s5293_s26  ;;  %4846 = vmatprep.mubr.msk.f32.mxu0 %vm5290_vm2, %v5289_v17 }
 0x2cb   : > { %v1063_v32 = vpop.permute.xlu1 %1062 }
 0x2cc   : > { %4835 = vmatpush3.xpose.msk.msra.mxu1 %vm987_vm3, %v1063_v32 }
 0x2cd   : > { %4839 = vmatprep.subr.mxu1 %v5289_v17 }
 0x2cf   : > { %4837 = vmatmul.mubr.msk.f32.vlgmr.msra.gmra.mxu1 %vm987_vm3, %v5527_v11  ;;  %v1215_v34 = vpop.permute.xlu1 %1214 }
 0x2d0   : > { %4840 = vmatpush3.xpose.msk.msra.mxu1 %vm987_vm3, %v1139_v33  ;;  %4845 = vmatpush3.xpose.msk.msra.mxu0 %vm987_vm3, %v1215_v34 }
 0x2d1   : > { %4841 = vmatprep.mubr.msk.f32.mxu1 %vm5290_vm2, %v5289_v17  ;;  %4854 = vmatprep.subr.mxu0 %v5289_v17 }
 0x2d2   : > { %4849 = vmatprep.subr.mxu1 %v5289_v17 }
 0x2d3   : > { %4842 = vmatmul.mubr.msk.f32.vlgmr.msra.gmra.mxu1 %vm987_vm3, %v5530_v16  ;;  %4847 = vmatmul.mubr.msk.f32.vlgmr.msra.gmra.mxu0 %vm987_vm3, %v5535_v18 }
 0x2d4   : > { %4856 = vmatprep.mubr.msk.f32.mxu0 %vm5290_vm2, %v5289_v17  ;;  %4851 = vmatprep.mubr.msk.f32.mxu1 %vm5290_vm2, %v5289_v17 }
 0x320   : > { %v1367_v35 = vpop.permute.xlu1 %1366 }
 0x321   : > { %4855 = vmatpush3.xpose.msk.msra.mxu0 %vm987_vm3, %v1367_v35 }
 0x322   : > { %v1291_v36 = vpop.permute.xlu0 %1290  ;;  %4864 = vmatprep.subr.mxu0 %v5289_v17 }
 0x323   : > { %4850 = vmatpush3.xpose.msk.msra.mxu1 %vm987_vm3, %v1291_v36 }
 0x324   : > { %4857 = vmatmul.mubr.msk.f32.vlgmr.msra.gmra.mxu0 %vm987_vm3, %v5555_v19  ;;  %4859 = vmatprep.subr.mxu1 %v5289_v17 }
 0x325   : > { %4866 = vmatprep.mubr.msk.f32.mxu0 %vm5290_vm2, %v5289_v17 }
 0x326   : > { %4852 = vmatmul.mubr.msk.f32.vlgmr.msra.gmra.mxu1 %vm987_vm3, %v5559_v20  ;;  %v1443_v37 = vpop.permute.xlu0 %1442 }
 0x327   : > { %4860 = vmatpush3.xpose.msk.msra.mxu1 %vm987_vm3, %v1443_v37  ;;  %4861 = vmatprep.mubr.msk.f32.mxu1 %vm5290_vm2, %v5289_v17 }
 0x328   : > { %4869 = vmatprep.subr.mxu1 %v5289_v17 }
 0x32a   : > { %v1519_v38 = vpop.permute.xlu1 %1518  ;;  %4862 = vmatmul.mubr.msk.f32.vlgmr.msra.gmra.mxu1 %vm987_vm3, %v5563_v21  ;;  %v1595_v39 = vpop.permute.xlu0 %1594 }
 0x32b   : > { %4865 = vmatpush3.xpose.msk.msra.mxu0 %vm987_vm3, %v1519_v38  ;;  %4870 = vmatpush3.xpose.msk.msra.mxu1 %vm987_vm3, %v1595_v39 }
 0x32c   : > { %4871 = vmatprep.mubr.msk.f32.mxu1 %vm5290_vm2, %v5289_v17  ;;  %4874 = vmatprep.subr.mxu0 %v5289_v17 }
 0x32d   : > { %4879 = vmatprep.subr.mxu1 %v5289_v17 }
 0x32e   : > { %v1671_v40 = vpop.permute.xlu1 %1670  ;;  %4867 = vmatmul.mubr.msk.f32.vlgmr.msra.gmra.mxu0 %vm987_vm3, %v5569_v23  ;;  %4872 = vmatmul.mubr.msk.f32.vlgmr.msra.gmra.mxu1 %vm987_vm3, %v5565_v22  ;;  %v1747_v41 = vpop.permute.xlu0 %1746 }
 0x32f   : > { %4875 = vmatpush3.xpose.msk.msra.mxu0 %vm987_vm3, %v1671_v40  ;;  %4880 = vmatpush3.xpose.msk.msra.mxu1 %vm987_vm3, %v1747_v41 }
 0x330   : > { %4876 = vmatprep.mubr.msk.f32.mxu0 %vm5290_vm2, %v5289_v17  ;;  %4881 = vmatprep.mubr.msk.f32.mxu1 %vm5290_vm2, %v5289_v17 }
 0x331   : > { %4884 = vmatprep.subr.mxu0 %v5289_v17  ;;  %4889 = vmatprep.subr.mxu1 %v5289_v17 }
 0x332   : > { %v1823_v42 = vpop.permute.xlu1 %1822  ;;  %4877 = vmatmul.mubr.msk.f32.vlgmr.msra.gmra.mxu0 %vm987_vm3, %v5577_v25  ;;  %4882 = vmatmul.mubr.msk.f32.vlgmr.msra.gmra.mxu1 %vm987_vm3, %v5571_v24  ;;  %v1899_v43 = vpop.permute.xlu0 %1898 }
 0x333   : > { %4885 = vmatpush3.xpose.msk.msra.mxu0 %vm987_vm3, %v1823_v42  ;;  %4890 = vmatpush3.xpose.msk.msra.mxu1 %vm987_vm3, %v1899_v43 }
 0x334   : > { %4886 = vmatprep.mubr.msk.f32.mxu0 %vm5290_vm2, %v5289_v17  ;;  %4891 = vmatprep.mubr.msk.f32.mxu1 %vm5290_vm2, %v5289_v17 }
 0x335   : > { %4894 = vmatprep.subr.mxu0 %v5289_v17  ;;  %4899 = vmatprep.subr.mxu1 %v5289_v17 }
 0x336   : > { %v1975_v44 = vpop.permute.xlu1 %1974  ;;  %4887 = vmatmul.mubr.msk.f32.vlgmr.msra.gmra.mxu0 %vm987_vm3, %v5585_v27  ;;  %4892 = vmatmul.mubr.msk.f32.vlgmr.msra.gmra.mxu1 %vm987_vm3, %v5579_v26  ;;  %v2051_v45 = vpop.permute.xlu0 %2050 }
 0x337   : > { %4895 = vmatpush3.xpose.msk.msra.mxu0 %vm987_vm3, %v1975_v44  ;;  %4900 = vmatpush3.xpose.msk.msra.mxu1 %vm987_vm3, %v2051_v45 }
 0x338   : > { %4896 = vmatprep.mubr.msk.f32.mxu0 %vm5290_vm2, %v5289_v17  ;;  %4901 = vmatprep.mubr.msk.f32.mxu1 %vm5290_vm2, %v5289_v17 }
 0x339   : > { %4904 = vmatprep.subr.mxu0 %v5289_v17  ;;  %4909 = vmatprep.subr.mxu1 %v5289_v17 }
 0x33a   : > { %v2127_v46 = vpop.permute.xlu1 %2126  ;;  %4897 = vmatmul.mubr.msk.f32.vlgmr.msra.gmra.mxu0 %vm987_vm3, %v5593_v29  ;;  %4902 = vmatmul.mubr.msk.f32.vlgmr.msra.gmra.mxu1 %vm987_vm3, %v5587_v28 }
 0x33b   : > { %v2417_v47 = vpop.permute.xlu0 %2416  ;;  %4905 = vmatpush3.xpose.msk.msra.mxu0 %vm987_vm3, %v2127_v46  ;;  %4906 = vmatprep.mubr.msk.f32.mxu0 %vm5290_vm2, %v5289_v17 }
 0x33c   : > { %4910 = vmatpush3.msra.mxu1 %v2417_v47  ;;  %4914 = vmatprep.subr.mxu0 %v5289_v17 }
 0x33d   : > { %4911 = vmatprep.mubr.msk.f32.mxu1 %vm5290_vm2, %v5289_v17  ;;  %4919 = vmatprep.subr.mxu1 %v5289_v17 }
 0x33e   : > { %4907 = vmatmul.mubr.msk.f32.vlgmr.msra.gmra.mxu0 %vm987_vm3, %v5601_v31 }
 0x33f   : > { %4916 = vmatprep.mubr.msk.f32.mxu0 %vm5290_vm2, %v5289_v17 }
 0x388   : > { %v1058_v51 = vpop.f32.mrf.mxu0 }
 0x389   : > { %v2202_v54 = vmul.f32 0.35355338, %v1058_v51 }
 0x38a   : > { %v4833_v55 = vpop.f32.mrf.mxu0 }
 0x38b   : > { %v5706_v56 = vadd.f32 %v5703_v53, %v2202_v54 }
 0x38d   : > { %v2240_v57 = vsel %vm987_vm3, %v5706_v56, -inf }
 0x38e   : > { %2241 = vmax.xlane.f32.xlu0 %v2240_v57 }
 0x38f   : > { %v1134_v58 = vpop.f32.mrf.mxu1 }
 0x390   : > { %v2203_v59 = vmul.f32 0.35355338, %v1134_v58 }
 0x391   : > { %v4838_v60 = vpop.f32.mrf.mxu1 }
 0x392   : > { %v5711_v61 = vadd.f32 %v5703_v53, %v2203_v59 }
 0x393   : > { %v1210_v62 = vpop.f32.mrf.mxu1  ;;  %v1286_v63 = vpop.f32.mrf.mxu0 }
 0x394   : > { %v2204_v0 = vmul.f32 0.35355338, %v1210_v62  ;;  %v2205_v1 = vmul.f32 0.35355338, %v1286_v63  ;;  %v2243_v2 = vsel %vm987_vm3, %v5711_v61, -inf }
 0x395   : > { %2244 = vmax.xlane.f32.xlu1 %v2243_v2  ;;  %v4843_v3 = vpop.f32.mrf.mxu1  ;;  %v4848_v4 = vpop.f32.mrf.mxu0 }
 0x396   : > { %v5716_v5 = vadd.f32 %v5703_v53, %v2204_v0  ;;  %v5721_v7 = vadd.f32 %v5703_v53, %v2205_v1 }
 0x398   : > { %v2246_v6 = vsel %vm987_vm3, %v5716_v5, -inf  ;;  %v2249_v8 = vsel %vm987_vm3, %v5721_v7, -inf }
 0x399   : > { %2247 = vmax.xlane.f32.xlu0 %v2246_v6 }
 0x39d   : > { %2250 = vmax.xlane.f32.xlu0 %v2249_v8 }
 0x3e4   : > { %v1438_v9 = vpop.f32.mrf.mxu0 }
 0x3e5   : > { %v2207_v10 = vmul.f32 0.35355338, %v1438_v9 }
 0x3e6   : > { %v1362_v12 = vpop.f32.mrf.mxu1  ;;  %v4858_v13 = vpop.f32.mrf.mxu0 }
 0x3e7   : > { %v2206_v14 = vmul.f32 0.35355338, %v1362_v12  ;;  %v5726_v15 = vadd.f32 %v5703_v53, %v2207_v10 }
 0x3e8   : > { %v4853_v30 = vpop.f32.mrf.mxu1 }
 0x3e9   : > { %v2255_v32 = vsel %vm987_vm3, %v5726_v15, -inf  ;;  %v5731_v33 = vadd.f32 %v5703_v53, %v2206_v14 }
 0x3ea   : > { %2256 = vmax.xlane.f32.xlu1 %v2255_v32  ;;  %v1514_v34 = vpop.f32.mrf.mxu1 }
 0x3eb   : > { %v2208_v35 = vmul.f32 0.35355338, %v1514_v34  ;;  %v2252_v36 = vsel %vm987_vm3, %v5731_v33, -inf }
 0x3ec   : > { %2253 = vmax.xlane.f32.xlu0 %v2252_v36  ;;  %v4863_v37 = vpop.f32.mrf.mxu1 }
 0x3ed   : > { %v5736_v38 = vadd.f32 %v5703_v53, %v2208_v35 }
 0x3ee   : > { %v1590_v39 = vpop.f32.mrf.mxu0  ;;  %v1666_v40 = vpop.f32.mrf.mxu1 }
 0x3ef   : > { %v2209_v41 = vmul.f32 0.35355338, %v1590_v39  ;;  %v2210_v42 = vmul.f32 0.35355338, %v1666_v40  ;;  %v2258_v43 = vsel %vm987_vm3, %v5736_v38, -inf }
 0x3f0   : > { %v4868_v44 = vpop.f32.mrf.mxu0  ;;  %2259 = vmax.xlane.f32.xlu0 %v2258_v43  ;;  %v4873_v45 = vpop.f32.mrf.mxu1 }
 0x3f1   : > { %v5741_v46 = vadd.f32 %v5703_v53, %v2209_v41  ;;  %v5744_v47 = vadd.f32 %v5703_v53, %v2210_v42 }
 0x3f2   : > { %v1742_v48 = vpop.f32.mrf.mxu0  ;;  %v1818_v49 = vpop.f32.mrf.mxu1 }
 0x3f3   : > { %v2211_v51 = vmul.f32 0.35355338, %v1742_v48  ;;  %v2212_v52 = vmul.f32 0.35355338, %v1818_v49  ;;  %v2261_v54 = vsel %vm987_vm3, %v5741_v46, -inf  ;;  %v2264_v55 = vsel %vm987_vm3, %v5744_v47, -inf }
 0x3f4   : > { %2262 = vmax.xlane.f32.xlu1 %v2261_v54  ;;  %v4878_v57 = vpop.f32.mrf.mxu0  ;;  %2265 = vmax.xlane.f32.xlu0 %v2264_v55  ;;  %v4883_v58 = vpop.f32.mrf.mxu1 }
 0x3f5   : > { %v5751_v59 = vadd.f32 %v5703_v53, %v2211_v51  ;;  %v5754_v60 = vadd.f32 %v5703_v53, %v2212_v52 }
 0x3f6   : > { %v1894_v62 = vpop.f32.mrf.mxu0  ;;  %v1970_v63 = vpop.f32.mrf.mxu1 }
 0x3f7   : > { %v2213_v0 = vmul.f32 0.35355338, %v1894_v62  ;;  %v2214_v1 = vmul.f32 0.35355338, %v1970_v63  ;;  %v2267_v2 = vsel %vm987_vm3, %v5751_v59, -inf  ;;  %v2270_v3 = vsel %vm987_vm3, %v5754_v60, -inf }
 0x3f8   : > { %2268 = vmax.xlane.f32.xlu1 %v2267_v2  ;;  %v4888_v4 = vpop.f32.mrf.mxu0  ;;  %2271 = vmax.xlane.f32.xlu0 %v2270_v3  ;;  %v4893_v6 = vpop.f32.mrf.mxu1 }
 0x3f9   : > { %v5761_v8 = vadd.f32 %v5703_v53, %v2213_v0  ;;  %v5764_v9 = vadd.f32 %v5703_v53, %v2214_v1 }
 0x3fa   : > { %v2046_v10 = vpop.f32.mrf.mxu0  ;;  %v2122_v12 = vpop.f32.mrf.mxu1 }
 0x3fb   : > { %v2215_v13 = vmul.f32 0.35355338, %v2046_v10  ;;  %v2273_v14 = vsel %vm987_vm3, %v5761_v8, -inf  ;;  %v2276_v30 = vsel %vm987_vm3, %v5764_v9, -inf }
 0x3fc   : > { %2274 = vmax.xlane.f32.xlu1 %v2273_v14  ;;  %v4898_v32 = vpop.f32.mrf.mxu0  ;;  %2277 = vmax.xlane.f32.xlu0 %v2276_v30  ;;  %v4903_v34 = vpop.f32.mrf.mxu1 }
 0x3fd   : > { %v5771_v35 = vadd.f32 %v5703_v53, %v2215_v13 }
 0x3fe   : > { %v2198_v36 = vpop.f32.mrf.mxu0 }
 0x3ff   : > { %v2217_v37 = vmul.f32 0.35355338, %v2198_v36  ;;  %v2279_v39 = vsel %vm987_vm3, %v5771_v35, -inf }
 0x400   : > { %2280 = vmax.xlane.f32.xlu1 %v2279_v39  ;;  %v4908_v40 = vpop.f32.mrf.mxu0 }
 0x401   : > { %v5776_v41 = vadd.f32 %v5703_v53, %v2217_v37 }
 0x403   : > { %v2285_v42 = vsel %vm987_vm3, %v5776_v41, -inf }
 0x404   : > { %2286 = vmax.xlane.f32.xlu1 %v2285_v42 }
 0x412   : > { %2568 = vrot.lane.b32.xlu0 %v5530_v16, %s5293_s26 }
 0x415   : > { %2492 = vrot.lane.b32.xlu1 %v5527_v11, %s5293_s26 }
 0x416   : > { %2644 = vrot.lane.b32.xlu0 %v5535_v18, %s5293_s26 }
 0x417   : > { %v2242_v43 = vpop.xlane.xlu0 %2241 }
 0x41a   : > { %2720 = vrot.lane.b32.xlu0 %v5559_v20, %s5293_s26 }
 0x41e   : > { %v2245_v44 = vpop.xlane.xlu1 %2244  ;;  %2796 = vrot.lane.b32.xlu0 %v5555_v19, %s5293_s26 }
 0x41f   : > { %v2289_v45 = vsub.f32 %v5711_v61, %v2245_v44 }
 0x421   : > { %v2306_v48 = vmul.f32 1.442695, %v2289_v45 }
 0x422   : > { %2872 = vrot.lane.b32.xlu0 %v5563_v21, %s5293_s26  ;;  %v2248_v16 = vpop.xlane.xlu0 %2247 }
 0x423   : > { %5125 = vpow2.f32 %v2306_v48  ;;  %v2290_v52 = vsub.f32 %v5716_v5, %v2248_v16 }
 0x425   : > { %v2308_v54 = vmul.f32 1.442695, %v2290_v52 }
 0x426   : > { %2948 = vrot.lane.b32.xlu0 %v5569_v23, %s5293_s26  ;;  %v2251_v11 = vpop.xlane.xlu0 %2250 }
 0x427   : > { %v2291_v18 = vsub.f32 %v5721_v7, %v2251_v11  ;;  %v2216_v7 = vmul.f32 0.35355338, %v2122_v12 }
 0x429   : > { %v2310_v20 = vmul.f32 1.442695, %v2291_v18  ;;  %v5809_v49 = vadd.f32 %v5703_v53, %v2216_v7 }
 0x42a   : > { %3024 = vrot.lane.b32.xlu0 %v5565_v22, %s5293_s26 }
 0x42b   : > { %5127 = vpow2.f32 %v2310_v20  ;;  %v2282_v22 = vsel %vm987_vm3, %v5809_v49, -inf }
 0x42e   : > { %3100 = vrot.lane.b32.xlu0 %v5577_v25, %s5293_s26  ;;  %v2288_v25 = vsub.f32 %v5706_v56, %v2242_v43 }
 0x430   : > { %v5800_v19 = vpop.eup %5125  ;;  %v2304_v51 = vmul.f32 1.442695, %v2288_v25 }
 0x431   : > { %v2339_v21 = vsel %vm987_vm3, %v5800_v19, 0.0 }
 0x432   : > { %5129 = vpow2.f32 %v2304_v51 }
 0x433   : > { %5131 = vpow2.f32 %v2308_v54 }
 0x438   : > { %v5804_v61 = vpop.eup %5127 }
 0x439   : > { %2340 = vadd.xlane.f32.xlu1 %v2339_v21  ;;  %v2345_v23 = vsel %vm987_vm3, %v5804_v61, 0.0 }
 0x43d   : > { %2346 = vadd.xlane.f32.xlu1 %v2345_v23 }
 0x43f   : > { %v5820_v5 = vpop.eup %5129 }
 0x440   : > { %v2336_v12 = vsel %vm987_vm3, %v5820_v5, 0.0  ;;  %v5826_v13 = vpop.eup %5131 }
 0x441   : > { %v2342_v36 = vsel %vm987_vm3, %v5826_v13, 0.0 }
 0x44d   : > { %2283 = vmax.xlane.f32.xlu0 %v2282_v22 }
 0x463   : > { %3176 = vrot.lane.b32.xlu0 %v5571_v24, %s5293_s26 }
 0x473   : > { %v2257_v55 = vpop.xlane.xlu1 %2256 }
 0x474   : > { %v2293_v57 = vsub.f32 %v5726_v15, %v2257_v55 }
 0x475   : > { %v2254_v53 = vpop.xlane.xlu0 %2253 }
 0x476   : > { %v2314_v58 = vmul.f32 1.442695, %v2293_v57  ;;  %v2292_v62 = vsub.f32 %v5731_v33, %v2254_v53 }
 0x478   : > { %5133 = vpow2.f32 %v2314_v58  ;;  %v2312_v63 = vmul.f32 1.442695, %v2292_v62 }
 0x479   : > { %v2260_v0 = vpop.xlane.xlu0 %2259 }
 0x47a   : > { %5135 = vpow2.f32 %v2312_v63  ;;  %v2294_v24 = vsub.f32 %v5736_v38, %v2260_v0 }
 0x47c   : > { %v2316_v56 = vmul.f32 1.442695, %v2294_v24 }
 0x47d   : > { %v2263_v1 = vpop.xlane.xlu1 %2262  ;;  %v2266_v2 = vpop.xlane.xlu0 %2265 }
 0x47e   : > { %5137 = vpow2.f32 %v2316_v56  ;;  %v2295_v3 = vsub.f32 %v5741_v46, %v2263_v1  ;;  %v2296_v15 = vsub.f32 %v5744_v47, %v2266_v2 }
 0x480   : > { %v2318_v4 = vmul.f32 1.442695, %v2295_v3  ;;  %v2320_v6 = vmul.f32 1.442695, %v2296_v15 }
 0x481   : > { %v2269_v10 = vpop.xlane.xlu1 %2268  ;;  %v2272_v33 = vpop.xlane.xlu0 %2271 }
 0x482   : > { %5139 = vpow2.f32 %v2318_v4  ;;  %v2297_v38 = vsub.f32 %v5751_v59, %v2269_v10  ;;  %v2298_v14 = vsub.f32 %v5754_v60, %v2272_v33  ;;  %2337 = vadd.xlane.f32.xlu0 %v2336_v12 }
 0x483   : > { %5141 = vpow2.f32 %v2320_v6 }
 0x484   : > { %v2322_v30 = vmul.f32 1.442695, %v2297_v38  ;;  %v2324_v46 = vmul.f32 1.442695, %v2298_v14 }
 0x485   : > { %v5830_v32 = vpop.eup %5133  ;;  %v2275_v47 = vpop.xlane.xlu1 %2274 }
 0x486   : > { %v2278_v34 = vpop.xlane.xlu0 %2277  ;;  %5143 = vpow2.f32 %v2322_v30  ;;  %v2299_v37 = vsub.f32 %v5761_v8, %v2275_v47  ;;  %2343 = vadd.xlane.f32.xlu0 %v2342_v36  ;;  %v2351_v59 = vsel %vm987_vm3, %v5830_v32, 0.0 }
 0x487   : > { %v2300_v39 = vsub.f32 %v5764_v9, %v2278_v34  ;;  %v5838_v60 = vpop.eup %5135  ;;  %5145 = vpow2.f32 %v2324_v46  ;;  %2352 = vadd.xlane.f32.xlu1 %v2351_v59 }
 0x488   : > { %v2326_v40 = vmul.f32 1.442695, %v2299_v37  ;;  %v2348_v43 = vsel %vm987_vm3, %v5838_v60, 0.0 }
 0x489   : > { %v2328_v42 = vmul.f32 1.442695, %v2300_v39  ;;  %v2281_v44 = vpop.xlane.xlu1 %2280 }
 0x48a   : > { %5147 = vpow2.f32 %v2326_v40  ;;  %v2301_v45 = vsub.f32 %v5771_v35, %v2281_v44  ;;  %2349 = vadd.xlane.f32.xlu0 %v2348_v43  ;;  %v2569_v0 = vpop.permute.xlu0 %2568 }
 0x48b   : > { %v5843_v8 = vpop.eup %5137  ;;  %5149 = vpow2.f32 %v2328_v42 }
 0x48c   : > { %v2330_v9 = vmul.f32 1.442695, %v2301_v45  ;;  %v2354_v16 = vsel %vm987_vm3, %v5843_v8, 0.0 }
 0x48d   : > { %v2287_v48 = vpop.xlane.xlu1 %2286 }
 0x48e   : > { %5151 = vpow2.f32 %v2330_v9  ;;  %v2303_v11 = vsub.f32 %v5776_v41, %v2287_v48  ;;  %2355 = vadd.xlane.f32.xlu0 %v2354_v16  ;;  %v2645_v24 = vpop.permute.xlu0 %2644 }
 0x48f   : > { %v5848_v18 = vpop.eup %5139 }
 0x490   : > { %v5850_v20 = vpop.eup %5141  ;;  %v2334_v21 = vmul.f32 1.442695, %v2303_v11  ;;  %v2357_v35 = vsel %vm987_vm3, %v5848_v18, 0.0 }
 0x491   : > { %v2493_v23 = vpop.permute.xlu1 %2492  ;;  %2358 = vadd.xlane.f32.xlu1 %v2357_v35  ;;  %v2360_v7 = vsel %vm987_vm3, %v5850_v20, 0.0 }
 0x492   : > { %5153 = vpow2.f32 %v2334_v21  ;;  %4915 = vmatpush3.msra.mxu0 %v2493_v23  ;;  %2361 = vadd.xlane.f32.xlu0 %v2360_v7  ;;  %v5883_v56 = vpop.permute.xlu0 %2720 }
 0x493   : > { %v5856_v22 = vpop.eup %5143  ;;  %4924 = vmatprep.subr.mxu0 %v5289_v17 }
 0x494   : > { %v5859_v41 = vpop.eup %5145  ;;  %v2363_v25 = vsel %vm987_vm3, %v5856_v22, 0.0 }
 0x495   : > { %2364 = vadd.xlane.f32.xlu1 %v2363_v25  ;;  %v2366_v51 = vsel %vm987_vm3, %v5859_v41, 0.0 }
 0x496   : > { %2367 = vadd.xlane.f32.xlu0 %v2366_v51  ;;  %v2797_v1 = vpop.permute.xlu0 %2796 }
 0x497   : > { %v5865_v52 = vpop.eup %5147 }
 0x498   : > { %v5867_v54 = vpop.eup %5149  ;;  %v2369_v55 = vsel %vm987_vm3, %v5865_v52, 0.0 }
 0x499   : > { %2370 = vadd.xlane.f32.xlu1 %v2369_v55  ;;  %v2372_v57 = vsel %vm987_vm3, %v5867_v54, 0.0 }
 0x49a   : > { %2373 = vadd.xlane.f32.xlu0 %v2372_v57  ;;  %v5891_v2 = vpop.permute.xlu0 %2872 }
 0x49b   : > { %v5873_v53 = vpop.eup %5151 }
 0x49c   : > { %v2375_v58 = vsel %vm987_vm3, %v5873_v53, 0.0 }
 0x49d   : > { %2376 = vadd.xlane.f32.xlu1 %v2375_v58 }
 0x49e   : > { %v2949_v15 = vpop.permute.xlu0 %2948 }
 0x49f   : > { %v5877_v62 = vpop.eup %5153 }
 0x4a0   : > { %v2381_v63 = vsel %vm987_vm3, %v5877_v62, 0.0 }
 0x4a1   : > { %2382 = vadd.xlane.f32.xlu1 %v2381_v63 }
 0x4b0   : > { %3328 = vrot.lane.b32.xlu0 %v5579_v26, %s5293_s26  ;;  %v5893_v26 = vpop.permute.xlu0 %3024 }
 0x4b4   : > { %3404 = vrot.lane.b32.xlu0 %v5593_v29, %s5293_s26  ;;  %v5896_v29 = vpop.permute.xlu0 %3100 }
 0x4b8   : > { %3480 = vrot.lane.b32.xlu0 %v5587_v28, %s5293_s26 }
 0x4bc   : > { %3556 = vrot.lane.b32.xlu0 %v5601_v31, %s5293_s26 }
 0x4c2   : > { %v2341_v3 = vpop.xlane.xlu1 %2340 }
 0x4c3   : > { %5155 = vrcp.f32 %v2341_v3 }
 0x4c6   : > { %v2347_v4 = vpop.xlane.xlu1 %2346 }
 0x4c7   : > { %5157 = vrcp.f32 %v2347_v4 }
 0x4d0   : > { %v5156_v6 = vpop.eup %5155 }
 0x4d1   : > { %v2401_v10 = vmul.f32 %v5156_v6, %v5800_v19 }
 0x4d3   : > { %4917 = vmatmul.mubr.msk.f32.vlgmr.msra.gmra.mxu0 %vm987_vm3, %v2401_v10 }
 0x4d4   : > { %v5158_v28 = vpop.eup %5157  ;;  %4925 = vmatpush3.msra.mxu0 %v2645_v24  ;;  %4926 = vmatprep.mubr.msk.f32.mxu0 %vm5290_vm2, %v5289_v17 }
 0x4d5   : > { %4934 = vmatprep.subr.mxu0 %v5289_v17  ;;  %v2403_v31 = vmul.f32 %v5158_v28, %v5804_v61 }
 0x4d6   : > { %v2284_v33 = vpop.xlane.xlu0 %2283 }
 0x4d7   : > { %v2302_v12 = vsub.f32 %v5809_v49, %v2284_v33  ;;  %4927 = vmatmul.mubr.msk.f32.vlgmr.msra.gmra.mxu0 %vm987_vm3, %v2403_v31 }
 0x4d8   : > { %4935 = vmatpush3.msra.mxu0 %v2797_v1  ;;  %4936 = vmatprep.mubr.msk.f32.mxu0 %vm5290_vm2, %v5289_v17 }
 0x4d9   : > { %v2332_v19 = vmul.f32 1.442695, %v2302_v12  ;;  %4944 = vmatprep.subr.mxu0 %v5289_v17 }
 0x4da   : > { %v3177_v61 = vpop.permute.xlu0 %3176 }
 0x4db   : > { %5159 = vpow2.f32 %v2332_v19 }
 0x4e8   : > { %v5908_v38 = vpop.eup %5159 }
 0x4e9   : > { %v2378_v14 = vsel %vm987_vm3, %v5908_v38, 0.0 }
 0x4ea   : > { %2379 = vadd.xlane.f32.xlu1 %v2378_v14 }
 0x4fb   : > { %3252 = vrot.lane.b32.xlu1 %v5585_v27, %s5293_s26 }
 0x50b   : > { %v2338_v49 = vpop.xlane.xlu0 %2337 }
 0x50c   : > { %5161 = vrcp.f32 %v2338_v49 }
 0x50f   : > { %v2344_v30 = vpop.xlane.xlu0 %2343 }
 0x510   : > { %5163 = vrcp.f32 %v2344_v30  ;;  %v2353_v46 = vpop.xlane.xlu1 %2352 }
 0x511   : > { %5165 = vrcp.f32 %v2353_v46 }
 0x513   : > { %v2350_v47 = vpop.xlane.xlu0 %2349 }
 0x514   : > { %5167 = vrcp.f32 %v2350_v47 }
 0x517   : > { %v2356_v34 = vpop.xlane.xlu0 %2355 }
 0x518   : > { %5169 = vrcp.f32 %v2356_v34 }
 0x519   : > { %v5162_v36 = vpop.eup %5161 }
 0x51a   : > { %v2359_v37 = vpop.xlane.xlu1 %2358  ;;  %v2400_v39 = vmul.f32 %v5162_v36, %v5820_v5 }
 0x51b   : > { %5171 = vrcp.f32 %v2359_v37  ;;  %v2362_v59 = vpop.xlane.xlu0 %2361 }
 0x51c   : > { %5173 = vrcp.f32 %v2362_v59  ;;  %4912 = vmatmul.mubr.msk.f32.vlgmr.msra.gmra.mxu1 %vm987_vm3, %v2400_v39 }
 0x51d   : > { %v5164_v27 = vpop.eup %5163  ;;  %4920 = vmatpush3.msra.mxu1 %v2569_v0  ;;  %4921 = vmatprep.mubr.msk.f32.mxu1 %vm5290_vm2, %v5289_v17 }
 0x51e   : > { %v5166_v40 = vpop.eup %5165  ;;  %v2365_v42 = vpop.xlane.xlu1 %2364  ;;  %4929 = vmatprep.subr.mxu1 %v5289_v17  ;;  %v2402_v43 = vmul.f32 %v5164_v27, %v5826_v13 }
 0x51f   : > { %5175 = vrcp.f32 %v2365_v42  ;;  %v2368_v44 = vpop.xlane.xlu0 %2367  ;;  %v2405_v5 = vmul.f32 %v5166_v40, %v5830_v32  ;;  %v4640_v42 = vld [vmem:[%s5451_s18] sm:$0xff]  }
 0x520   : > { %5177 = vrcp.f32 %v2368_v44  ;;  %4922 = vmatmul.mubr.msk.f32.vlgmr.msra.gmra.mxu1 %vm987_vm3, %v2402_v43  ;;  %v4642_v43 = vunpack.c.h.bf16 %v4640_v42  ;;  %v4641_v44 = vunpack.c.l.bf16 %v4640_v42 }
 0x521   : > { %v5168_v45 = vpop.eup %5167  ;;  %4930 = vmatpush3.msra.mxu1 %v5883_v56  ;;  %4937 = vmatmul.mubr.msk.f32.vlgmr.msra.gmra.mxu0 %vm987_vm3, %v2405_v5 }
 0x522   : > { %4945 = vmatpush3.msra.mxu0 %v2949_v15  ;;  %4931 = vmatprep.mubr.msk.f32.mxu1 %vm5290_vm2, %v5289_v17  ;;  %v2404_v9 = vmul.f32 %v5168_v45, %v5838_v60 }
 0x523   : > { %4939 = vmatprep.subr.mxu1 %v5289_v17  ;;  %v2374_v13 = vpop.xlane.xlu0 %2373  ;;  %4946 = vmatprep.mubr.msk.f32.mxu0 %vm5290_vm2, %v5289_v17 }
 0x524   : > { %5179 = vrcp.f32 %v2374_v13  ;;  %4932 = vmatmul.mubr.msk.f32.vlgmr.msra.gmra.mxu1 %vm987_vm3, %v2404_v9  ;;  %4954 = vmatprep.subr.mxu0 %v5289_v17 }
 0x525   : > { %v5170_v32 = vpop.eup %5169  ;;  %4940 = vmatpush3.msra.mxu1 %v5891_v2  ;;  %4941 = vmatprep.mubr.msk.f32.mxu1 %vm5290_vm2, %v5289_v17 }
 0x526   : > { %4949 = vmatprep.subr.mxu1 %v5289_v17  ;;  %v2406_v60 = vmul.f32 %v5170_v32, %v5843_v8 }
 0x527   : > { %v3329_v48 = vpop.permute.xlu0 %3328 }
 0x528   : > { %v5172_v16 = vpop.eup %5171  ;;  %4942 = vmatmul.mubr.msk.f32.vlgmr.msra.gmra.mxu1 %vm987_vm3, %v2406_v60 }
 0x529   : > { %v5174_v11 = vpop.eup %5173  ;;  %4950 = vmatpush3.msra.mxu1 %v5893_v26  ;;  %v2407_v21 = vmul.f32 %v5172_v16, %v5848_v18  ;;  %4951 = vmatprep.mubr.msk.f32.mxu1 %vm5290_vm2, %v5289_v17 }
 0x52a   : > { %4959 = vmatprep.subr.mxu1 %v5289_v17  ;;  %v2408_v35 = vmul.f32 %v5174_v11, %v5850_v20 }
 0x52b   : > { %4947 = vmatmul.mubr.msk.f32.vlgmr.msra.gmra.mxu0 %vm987_vm3, %v2407_v21  ;;  %v3405_v7 = vpop.permute.xlu0 %3404 }
 0x52c   : > { %v5176_v23 = vpop.eup %5175  ;;  %4955 = vmatpush3.msra.mxu0 %v5896_v29  ;;  %4952 = vmatmul.mubr.msk.f32.vlgmr.msra.gmra.mxu1 %vm987_vm3, %v2408_v35 }
 0x52d   : > { %v5178_v8 = vpop.eup %5177  ;;  %4960 = vmatpush3.msra.mxu1 %v3177_v61  ;;  %4956 = vmatprep.mubr.msk.f32.mxu0 %vm5290_vm2, %v5289_v17  ;;  %v2409_v18 = vmul.f32 %v5176_v23, %v5856_v22 }
 0x52e   : > { %4961 = vmatprep.mubr.msk.f32.mxu1 %vm5290_vm2, %v5289_v17  ;;  %4969 = vmatprep.subr.mxu1 %v5289_v17  ;;  %v2410_v20 = vmul.f32 %v5178_v8, %v5859_v41  ;;  %v2371_v41 = vpop.xlane.xlu1 %2370 }
 0x52f   : > { %4957 = vmatmul.mubr.msk.f32.vlgmr.msra.gmra.mxu0 %vm987_vm3, %v2409_v18  ;;  %4964 = vmatprep.subr.mxu0 %v5289_v17  ;;  %v3481_v51 = vpop.permute.xlu0 %3480  ;;  %5181 = vrcp.f32 %v2371_v41 }
 0x530   : > { %4962 = vmatmul.mubr.msk.f32.vlgmr.msra.gmra.mxu1 %vm987_vm3, %v2410_v20  ;;  %4966 = vmatprep.mubr.msk.f32.mxu0 %vm5290_vm2, %v5289_v17 }
 0x531   : > { %v5180_v25 = vpop.eup %5179  ;;  %4970 = vmatpush3.msra.mxu1 %v3329_v48  ;;  %4971 = vmatprep.mubr.msk.f32.mxu1 %vm5290_vm2, %v5289_v17 }
 0x532   : > { %4979 = vmatprep.subr.mxu1 %v5289_v17  ;;  %v2412_v22 = vmul.f32 %v5180_v25, %v5867_v54  ;;  %v2377_v55 = vpop.xlane.xlu1 %2376 }
 0x533   : > { %5183 = vrcp.f32 %v2377_v55  ;;  %v3557_v2 = vpop.permute.xlu0 %3556 }
 0x534   : > { %4972 = vmatmul.mubr.msk.f32.vlgmr.msra.gmra.mxu1 %vm987_vm3, %v2412_v22 }
 0x535   : > { %4980 = vmatpush3.msra.mxu1 %v3481_v51  ;;  %4981 = vmatprep.mubr.msk.f32.mxu1 %vm5290_vm2, %v5289_v17 }
 0x536   : > { %v2383_v57 = vpop.xlane.xlu1 %2382 }
 0x537   : > { %5185 = vrcp.f32 %v2383_v57 }
 0x53c   : > { %v5182_v63 = vpop.eup %5181 }
 0x53d   : > { %v2411_v24 = vmul.f32 %v5182_v63, %v5865_v52 }
 0x540   : > { %v5184_v54 = vpop.eup %5183 }
 0x541   : > { %v2413_v56 = vmul.f32 %v5184_v54, %v5873_v53 }
 0x544   : > { %v5186_v1 = vpop.eup %5185 }
 0x545   : > { %v2415_v52 = vmul.f32 %v5186_v1, %v5877_v62 }
 0x573   : > { %v2380_v58 = vpop.xlane.xlu1 %2379 }
 0x574   : > { %5187 = vrcp.f32 %v2380_v58 }
 0x577   : > { %v3253_v0 = vpop.permute.xlu1 %3252 }
 0x578   : > { %4965 = vmatpush3.msra.mxu0 %v3253_v0 }
 0x579   : > { %4967 = vmatmul.mubr.msk.f32.vlgmr.msra.gmra.mxu0 %vm987_vm3, %v2411_v24  ;;  %4974 = vmatprep.subr.mxu0 %v5289_v17 }
 0x57a   : > { %4975 = vmatpush3.msra.mxu0 %v3405_v7  ;;  %4976 = vmatprep.mubr.msk.f32.mxu0 %vm5290_vm2, %v5289_v17 }
 0x57b   : > { %4984 = vmatprep.subr.mxu0 %v5289_v17 }
 0x57d   : > { %4977 = vmatmul.mubr.msk.f32.vlgmr.msra.gmra.mxu0 %vm987_vm3, %v2413_v56 }
 0x57e   : > { %4985 = vmatpush3.msra.mxu0 %v3557_v2  ;;  %4986 = vmatprep.mubr.msk.f32.mxu0 %vm5290_vm2, %v5289_v17 }
 0x581   : > { %v5188_v3 = vpop.eup %5187  ;;  %4987 = vmatmul.mubr.msk.f32.vlgmr.msra.gmra.mxu0 %vm987_vm3, %v2415_v52 }
 0x582   : > { %v2414_v15 = vmul.f32 %v5188_v3, %v5908_v38  ;;  %v4688_v38 = vld [vmem:[%s5451_s18 + $0x8] sm:$0xff]  }
 0x583   : > { %v4646_v61 = vunpack.c.h.bf16 %v4688_v38  ;;  %v4645_v40 = vunpack.c.l.bf16 %v4688_v38 }
 0x584   : > { %4982 = vmatmul.mubr.msk.f32.vlgmr.msra.gmra.mxu1 %vm987_vm3, %v2414_v15 }
 0x585   : > { %4989 = vmatprep.subr.mxu0 %v4646_v61 }
 0x586   : > { %4990 = vmatpush3.msra.mxu0 %v4646_v61 }
 0x587   : > { %4991 = vmatprep.subr.mxu0 %v4645_v40 }
 0x588   : > { %4992 = vmatpush3.msra.mxu0 %v4645_v40 }
 0x589   : > { %4993 = vmatprep.subr.mxu0 %v4642_v43 }
 0x58a   : > { %4994 = vmatpush3.msra.mxu0 %v4642_v43 }
 0x58b   : > { %4995 = vmatprep.subr.mxu0 %v4641_v44 }
 0x58c   : > { %4996 = vmatpush3.msra.mxu0 %v4641_v44 }
 0x593   : > { %v5980_v4 = vpop.f32.mrf.mxu0 }
 0x595   : > { %v4918_v53 = vpop.f32.mrf.mxu0 }
 0x596   : > { %v5213_v53 = vld [vmem:[#allocation2 + $0x8] sm:$0xff] }
 0x597   : > { %v5982_v26 = vpop.f32.mrf.mxu0 }
 0x599   : > { %v4928_v6 = vpop.f32.mrf.mxu0 }
 0x5dc   : > { %v5984_v10 = vpop.f32.mrf.mxu1 }
 0x5de   : > { %v4913_v29 = vpop.f32.mrf.mxu1 }
 0x5df   : > { %v5214_v29 = vld [vmem:[#allocation2] sm:$0xff] }
 0x5e0   : > { %v2640_v17 = vpop.f32.mrf.mxu1 }
 0x5e1   : > { %v2868_v28 = vpop.f32.mrf.mxu0 }
 0x5e2   : > { %3638 = vrot.lane.b32.xlu1 %v2868_v28, %s5295_s30  ;;  %v4923_v62 = vpop.f32.mrf.mxu1 }
 0x5e3   : > { %v4938_v31 = vpop.f32.mrf.mxu0 }
 0x5e4   : > { %v2792_v33 = vpop.f32.mrf.mxu1 }
 0x5e5   : > { %3636 = vrot.lane.b32.xlu0 %v2792_v33, %s5295_s30 }
 0x5e6   : > { %v4933_v12 = vpop.f32.mrf.mxu1 }
 0x5e8   : > { %v2944_v19 = vpop.f32.mrf.mxu1 }
 0x5e9   : > { %3640 = vrot.lane.b32.xlu0 %v2944_v19, %s5295_s30  ;;  %v5215_v19 = vld [vmem:[#allocation2 + $0x18] sm:$0xff] }
 0x5ea   : > { %v4943_v14 = vpop.f32.mrf.mxu1 }
 0x5eb   : > { %v3020_v49 = vpop.f32.mrf.mxu0  ;;  %v5216_v14 = vld [vmem:[#allocation2 + $0x10] sm:$0xff] }
 0x5ec   : > { %3642 = vrot.lane.b32.xlu1 %v3020_v49, %s5295_s30  ;;  %v3096_v30 = vpop.f32.mrf.mxu1  ;;  %s6160_s30 = sld [smem:[#allocation17_spill]] (!%p4617_p2) }
 0x5ed   : > { %v4948_v46 = vpop.f32.mrf.mxu0  ;;  %3652 = vrot.lane.b32.xlu0 %v3096_v30, %s5296_s19 }
 0x5ee   : > { %v4953_v47 = vpop.f32.mrf.mxu1 }
 0x5ef   : > { %v3172_v34 = vpop.f32.mrf.mxu0 }
 0x5f0   : > { %3654 = vrot.lane.b32.xlu1 %v3172_v34, %s5296_s19  ;;  %v3248_v36 = vpop.f32.mrf.mxu1 }
 0x5f1   : > { %v4958_v37 = vpop.f32.mrf.mxu0  ;;  %3656 = vrot.lane.b32.xlu0 %v3248_v36, %s5296_s19 }
 0x5f2   : > { %v4963_v39 = vpop.f32.mrf.mxu1 }
 0x5f4   : > { %v3400_v59 = vpop.f32.mrf.mxu1 }
 0x5f5   : > { %3668 = vrot.lane.b32.xlu0 %v3400_v59, %s5297_s21 }
 0x5f6   : > { %v4973_v27 = vpop.f32.mrf.mxu1 }
 0x639   : > { %v3324_v5 = vpop.f32.mrf.mxu0 }
 0x63a   : > { %3658 = vrot.lane.b32.xlu1 %v3324_v5, %s5296_s19 }
 0x63b   : > { %v4968_v45 = vpop.f32.mrf.mxu0 }
 0x63d   : > { %v3476_v9 = vpop.f32.mrf.mxu0 }
 0x63e   : > { %3670 = vrot.lane.b32.xlu1 %v3476_v9, %s5297_s21 }
 0x63f   : > { %v4978_v13 = vpop.f32.mrf.mxu0 }
 0x641   : > { %v3628_v32 = vpop.f32.mrf.mxu0 }
 0x642   : > { %3674 = vrot.lane.b32.xlu1 %v3628_v32, %s5297_s21 }
 0x643   : > { %v4988_v60 = vpop.f32.mrf.mxu0 }
 0x644   : > { %v3552_v16 = vpop.f32.mrf.mxu1 }
 0x645   : > { %3672 = vrot.lane.b32.xlu0 %v3552_v16, %s5297_s21 }
 0x646   : > { %v4983_v48 = vpop.f32.mrf.mxu1 }
 0x654   : > { %v3639_v51 = vpop.permute.xlu1 %3638 }
 0x655   : > { %v3681_v58 = vsel %vm987_vm3, %v5980_v4, %v3639_v51  ;;  %v4604_v4 = vld [vmem:[%s6158_s17] ss:$0 sm:$0xff] }
 0x657   : > { %v3637_v11 = vpop.permute.xlu0 %3636 }
 0x658   : > { %v3680_v7 = vsel %vm987_vm3, %v5984_v10, %v3637_v11 }
 0x65b   : > { %v3641_v21 = vpop.permute.xlu0 %3640 }
 0x65c   : > { %v3682_v23 = vsel %vm987_vm3, %v2640_v17, %v3641_v21 }
 0x65e   : > { %v3643_v41 = vpop.permute.xlu1 %3642 }
 0x65f   : > { %v3653_v35 = vpop.permute.xlu0 %3652  ;;  %v3683_v56 = vsel %vm987_vm3, %v5982_v26, %v3643_v41 }
 0x660   : > { %v3685_v20 = vsel %vm3684_vm5, %v3680_v7, %v3653_v35  ;;  %v4689_v35 = vld [vmem:[%s5468_s5 + $0x8] sm:$0xff]  }
 0x662   : > { %v3655_v55 = vpop.permute.xlu1 %3654 }
 0x663   : > { %v3657_v8 = vpop.permute.xlu0 %3656  ;;  %v3686_v63 = vsel %vm3684_vm5, %v3681_v58, %v3655_v55 }
 0x664   : > { %v3687_v18 = vsel %vm3684_vm5, %v3682_v23, %v3657_v8  ;;  %v4654_v23 = vunpack.c.h.bf16 %v4689_v35  ;;  %v4653_v8 = vunpack.c.l.bf16 %v4689_v35 }
 0x666   : > { %5003 = vmatprep.subr.mxu0 %v4654_v23 }
 0x667   : > { %v3669_v25 = vpop.permute.xlu0 %3668 }
 0x668   : > { %v3690_v22 = vsel %vm3689_vm6, %v3685_v20, %v3669_v25 }
 0x669   : > { %4997 = vmatprep.mubr.msk.f32.mxu0 %vm771_vm1, %v3690_v22 }
 0x6ac   : > { %v3659_v57 = vpop.permute.xlu1 %3658 }
 0x6ad   : > { %v3688_v2 = vsel %vm3684_vm5, %v3683_v56, %v3659_v57 }
 0x6b0   : > { %v3671_v0 = vpop.permute.xlu1 %3670 }
 0x6b1   : > { %v3691_v24 = vsel %vm3689_vm6, %v3686_v63, %v3671_v0 }
 0x6b2   : > { %4998 = vmatmul.mubr.msk.f32.vlgmr.msra.gmra.mxu0 %vm771_vm1, %v3691_v24 }
 0x6b3   : > { %5004 = vmatpush3.msra.mxu0 %v4654_v23  ;;  %v4607_v23 = vld [vmem:[%s738_s7] ss:$0 sm:$0xff]  ;;  %s6162_s7 = sld [smem:[#allocation16_spill]] (!%p4617_p2) }
 0x6b4   : > { %v3675_v54 = vpop.permute.xlu1 %3674  ;;  %5005 = vmatprep.subr.mxu0 %v4653_v8 }
 0x6b5   : > { %v3693_v3 = vsel %vm3689_vm6, %v3688_v2, %v3675_v54  ;;  %5006 = vmatpush3.msra.mxu0 %v4653_v8 }
 0x6b7   : > { %v3673_v1 = vpop.permute.xlu0 %3672 }
 0x6b8   : > { %v3692_v52 = vsel %vm3689_vm6, %v3687_v18, %v3673_v1  ;;  %v4648_v18 = vld [vmem:[%s5468_s5] sm:$0xff]  }
 0x6b9   : > { %5000 = vmatprep.mubr.msk.f32.mxu0 %vm771_vm1, %v3692_v52  ;;  %v4650_v7 = vunpack.c.h.bf16 %v4648_v18  ;;  %v4649_v20 = vunpack.c.l.bf16 %v4648_v18  ;;  %v4605_v52 = vld [vmem:[%s727_s15] ss:$0 sm:$0xff] }
 0x6ba   : > { %5001 = vmatmul.mubr.msk.f32.gmra.mxu0 %vm771_vm1, %v3693_v3 }
 0x6bb   : > { %5007 = vmatprep.subr.mxu0 %v4650_v7 }
 0x6bc   : > { %5008 = vmatpush3.msra.mxu0 %v4650_v7 }
 0x6bd   : > { %5009 = vmatprep.subr.mxu0 %v4649_v20 }
 0x6be   : > { %5010 = vmatpush3.msra.mxu0 %v4649_v20 }
 0x772   : > { %v4999_v15 = vpop.f32.mrf.mxu0 }
 0x773   : > { %v3800_v6 = vadd.f32 %v5213_v53, %v4999_v15  ;;  %v4606_v53 = vld [vmem:[%s730_s1] ss:$0 sm:$0xff] }
 0x774   : > { %v3780_v26 = vpop.f32.mrf.mxu0 }
 0x775   : > { %v6012_v10 = vadd.f32 %v4604_v4, %v3800_v6  ;;  %v3799_v17 = vadd.f32 %v5214_v29, %v3780_v26 }
 0x777   : > { %v6014_v28 = vadd.f32 %v4604_v4, %v3799_v17  ;;  %v3819_v62 = vsel %vm771_vm1, %v6012_v10, 0.0 }
 0x778   : > { %3820 = vadd.xlane.f32.xlu1 %v3819_v62 }
 0x779   : > { %v3816_v31 = vsel %vm771_vm1, %v6014_v28, 0.0 }
 0x77a   : > { %3817 = vadd.xlane.f32.xlu0 %v3816_v31  ;;  %v5002_v33 = vpop.f32.mrf.mxu0 }
 0x77b   : > { %v3802_v38 = vadd.f32 %v5215_v19, %v5002_v33 }
 0x77c   : > { %v3790_v12 = vpop.f32.mrf.mxu0 }
 0x77d   : > { %v3801_v61 = vadd.f32 %v5216_v14, %v3790_v12  ;;  %v6022_v30 = vadd.f32 %v4604_v4, %v3802_v38 }
 0x77f   : > { %v6020_v49 = vadd.f32 %v4604_v4, %v3801_v61  ;;  %v3825_v47 = vsel %vm771_vm1, %v6022_v30, 0.0  ;;  %v4696_v61 = vld [vmem:[%s5478_s25 + $0x38] sm:$0xff]  }
 0x781   : > { %v3822_v46 = vsel %vm771_vm1, %v6020_v49, 0.0 }
 0x782   : > { %3823 = vadd.xlane.f32.xlu0 %v3822_v46  ;;  %v4686_v46 = vunpack.c.h.bf16 %v4696_v61 }
 0x784   : > { %5017 = vmatprep.subr.mxu1 %v4686_v46 }
 0x785   : > { %5018 = vmatpush3.msra.mxu1 %v4686_v46 }
 0x786   : > { %3826 = vadd.xlane.f32.xlu0 %v3825_v47  ;;  %v4685_v47 = vunpack.c.l.bf16 %v4696_v61 }
 0x788   : > { %5019 = vmatprep.subr.mxu1 %v4685_v47 }
 0x789   : > { %5020 = vmatpush3.msra.mxu1 %v4685_v47 }
 0x801   : > { %v3821_v34 = vpop.xlane.xlu1 %3820 }
 0x802   : > { %v3829_v36 = vmul.f32 0.03125, %v3821_v34  ;;  %v4695_v34 = vld [vmem:[%s5478_s25 + $0x30] sm:$0xff]  }
 0x803   : > { %v3818_v37 = vpop.xlane.xlu0 %3817 }
 0x804   : > { %v3833_v39 = vsub.f32 %v6012_v10, %v3829_v36  ;;  %v3828_v59 = vmul.f32 0.03125, %v3818_v37  ;;  %v4682_v36 = vunpack.c.h.bf16 %v4695_v34  ;;  %v4681_v37 = vunpack.c.l.bf16 %v4695_v34 }
 0x806   : > { %v3832_v27 = vsub.f32 %v6014_v28, %v3828_v59  ;;  %v3837_v40 = vmul.f32 %v3833_v39, %v3833_v39  ;;  %5021 = vmatprep.subr.mxu1 %v4682_v36 }
 0x807   : > { %5022 = vmatpush3.msra.mxu1 %v4682_v36 }
 0x808   : > { %v3843_v42 = vsel %vm771_vm1, %v3837_v40, 0.0  ;;  %v3836_v43 = vmul.f32 %v3832_v27, %v3832_v27  ;;  %5023 = vmatprep.subr.mxu1 %v4681_v37  ;;  %v4693_v40 = vld [vmem:[%s5478_s25 + $0x20] sm:$0xff]  }
 0x809   : > { %3844 = vadd.xlane.f32.xlu0 %v3843_v42  ;;  %5024 = vmatpush3.msra.mxu1 %v4681_v37  ;;  %v4674_v42 = vunpack.c.h.bf16 %v4693_v40 }
 0x80a   : > { %v3840_v44 = vsel %vm771_vm1, %v3836_v43, 0.0  ;;  %v4673_v43 = vunpack.c.l.bf16 %v4693_v40 }
 0x80b   : > { %3841 = vadd.xlane.f32.xlu1 %v3840_v44  ;;  %v3824_v5 = vpop.xlane.xlu0 %3823  ;;  %v4692_v44 = vld [vmem:[%s5478_s25 + $0x18] sm:$0xff]  }
 0x80c   : > { %v3830_v45 = vmul.f32 0.03125, %v3824_v5  ;;  %v4670_v5 = vunpack.c.h.bf16 %v4692_v44 }
 0x80e   : > { %v3834_v9 = vsub.f32 %v6020_v49, %v3830_v45  ;;  %v4669_v45 = vunpack.c.l.bf16 %v4692_v44 }
 0x80f   : > { %v3827_v13 = vpop.xlane.xlu0 %3826 }
 0x810   : > { %v3831_v32 = vmul.f32 0.03125, %v3827_v13  ;;  %v3838_v60 = vmul.f32 %v3834_v9, %v3834_v9 }
 0x812   : > { %v3835_v16 = vsub.f32 %v6022_v30, %v3831_v32  ;;  %v3846_v48 = vsel %vm771_vm1, %v3838_v60, 0.0  ;;  %v4690_v60 = vld [vmem:[%s5478_s25 + $0x8] sm:$0xff]  }
 0x813   : > { %3847 = vadd.xlane.f32.xlu1 %v3846_v48  ;;  %v4661_v48 = vunpack.c.l.bf16 %v4690_v60 }
 0x814   : > { %v3839_v11 = vmul.f32 %v3835_v16, %v3835_v16 }
 0x816   : > { %v3849_v21 = vsel %vm771_vm1, %v3839_v11, 0.0  ;;  %v4656_v11 = vld [vmem:[%s5478_s25] sm:$0xff]  }
 0x817   : > { %3850 = vadd.xlane.f32.xlu0 %v3849_v21  ;;  %v4658_v21 = vunpack.c.h.bf16 %v4656_v11  ;;  %v4657_v35 = vunpack.c.l.bf16 %v4656_v11 }
 0x892   : > { %v3845_v25 = vpop.xlane.xlu0 %3844 }
 0x893   : > { %v3853_v22 = vmul.f32 0.03125, %v3845_v25 }
 0x894   : > { %v3842_v51 = vpop.xlane.xlu1 %3841 }
 0x895   : > { %v3857_v41 = vadd.f32 1e-05, %v3853_v22  ;;  %v3852_v55 = vmul.f32 0.03125, %v3842_v51 }
 0x897   : > { %5189 = vrsqrt.f32 %v3857_v41  ;;  %v3856_v57 = vadd.f32 1e-05, %v3852_v55 }
 0x899   : > { %5191 = vrsqrt.f32 %v3856_v57 }
 0x89c   : > { %v3848_v58 = vpop.xlane.xlu1 %3847 }
 0x89d   : > { %v3854_v63 = vmul.f32 0.03125, %v3848_v58 }
 0x89f   : > { %v3858_v0 = vadd.f32 1e-05, %v3854_v63 }
 0x8a0   : > { %v3851_v24 = vpop.xlane.xlu0 %3850 }
 0x8a1   : > { %5193 = vrsqrt.f32 %v3858_v0  ;;  %v3855_v54 = vmul.f32 0.03125, %v3851_v24 }
 0x8a3   : > { %v3859_v56 = vadd.f32 1e-05, %v3855_v54 }
 0x8a4   : > { %v5190_v1 = vpop.eup %5189 }
 0x8a5   : > { %v3865_v2 = vmul.f32 %v5190_v1, %v3833_v39  ;;  %5195 = vrsqrt.f32 %v3859_v56  ;;  %v4694_v39 = vld [vmem:[%s5478_s25 + $0x28] sm:$0xff]  }
 0x8a6   : > { %v5192_v3 = vpop.eup %5191  ;;  %v4678_v59 = vunpack.c.h.bf16 %v4694_v39 }
 0x8a7   : > { %v3864_v15 = vmul.f32 %v5192_v3, %v3832_v27  ;;  %v3875_v4 = vmul.f32 %v4605_v52, %v3865_v2  ;;  %v4677_v27 = vunpack.c.l.bf16 %v4694_v39 }
 0x8a8   : > { %5025 = vmatprep.subr.mxu1 %v4678_v59 }
 0x8a9   : > { %v3874_v6 = vmul.f32 %v4605_v52, %v3864_v15  ;;  %v3885_v29 = vadd.f32 %v4606_v53, %v3875_v4  ;;  %5026 = vmatpush3.msra.mxu1 %v4678_v59 }
 0x8aa   : > { %5027 = vmatprep.subr.mxu1 %v4677_v27 }
 0x8ab   : > { %v3884_v26 = vadd.f32 %v4606_v53, %v3874_v6  ;;  %5028 = vmatpush3.msra.mxu1 %v4677_v27 }
 0x8ac   : > { %5029 = vmatprep.subr.mxu1 %v4674_v42 }
 0x8ad   : > { %5011 = vmatprep.mubr.msk.f32.mxu0 %vm771_vm1, %v3884_v26  ;;  %5030 = vmatpush3.msra.mxu1 %v4674_v42 }
 0x8ae   : > { %v5194_v17 = vpop.eup %5193  ;;  %5012 = vmatmul.mubr.msk.f32.vlgmr.msra.gmra.mxu0 %vm771_vm1, %v3885_v29  ;;  %5031 = vmatprep.subr.mxu1 %v4673_v43 }
 0x8af   : > { %v3866_v62 = vmul.f32 %v5194_v17, %v3834_v9  ;;  %5032 = vmatpush3.msra.mxu1 %v4673_v43  ;;  %v4691_v9 = vld [vmem:[%s5478_s25 + $0x10] sm:$0xff]  }
 0x8b0   : > { %5033 = vmatprep.subr.mxu1 %v4670_v5  ;;  %v4666_v13 = vunpack.c.h.bf16 %v4691_v9  ;;  %v4665_v32 = vunpack.c.l.bf16 %v4691_v9 }
 0x8b1   : > { %v3876_v31 = vmul.f32 %v4605_v52, %v3866_v62  ;;  %5034 = vmatpush3.msra.mxu1 %v4670_v5 }
 0x8b2   : > { %v5196_v33 = vpop.eup %5195  ;;  %5035 = vmatprep.subr.mxu1 %v4669_v45 }
 0x8b3   : > { %v3886_v12 = vadd.f32 %v4606_v53, %v3876_v31  ;;  %v3867_v19 = vmul.f32 %v5196_v33, %v3835_v16  ;;  %5036 = vmatpush3.msra.mxu1 %v4669_v45  ;;  %v4662_v16 = vunpack.c.h.bf16 %v4690_v60 }
 0x8b4   : > { %5037 = vmatprep.subr.mxu1 %v4666_v13 }
 0x8b5   : > { %5014 = vmatprep.mubr.msk.f32.mxu0 %vm771_vm1, %v3886_v12  ;;  %v3877_v38 = vmul.f32 %v4605_v52, %v3867_v19  ;;  %5038 = vmatpush3.msra.mxu1 %v4666_v13 }
 0x8b6   : > { %5039 = vmatprep.subr.mxu1 %v4665_v32 }
 0x8b7   : > { %v3887_v14 = vadd.f32 %v4606_v53, %v3877_v38  ;;  %5040 = vmatpush3.msra.mxu1 %v4665_v32 }
 0x8b8   : > { %5041 = vmatprep.subr.mxu1 %v4662_v16 }
 0x8b9   : > { %5015 = vmatmul.mubr.msk.f32.gmra.mxu0 %vm771_vm1, %v3887_v14  ;;  %5042 = vmatpush3.msra.mxu1 %v4662_v16  ;;  %v4616_v14 = vld [vmem:[%s746_s0] ss:$0 sm:$0xff] }
 0x8ba   : > { %5043 = vmatprep.subr.mxu1 %v4661_v48 }
 0x8bb   : > { %5044 = vmatpush3.msra.mxu1 %v4661_v48 }
 0x8bc   : > { %5045 = vmatprep.subr.mxu1 %v4658_v21 }
 0x8bd   : > { %5046 = vmatpush3.msra.mxu1 %v4658_v21 }
 0x8be   : > { %5047 = vmatprep.subr.mxu1 %v4657_v35 }
 0x8bf   : > { %5048 = vmatpush3.msra.mxu1 %v4657_v35 }
 0x96e   : > { %v5013_v8 = vpop.f32.mrf.mxu0 }
 0x96f   : > { %v3987_v18 = vadd.f32 %v5013_v8, %v4607_v23 }
 0x970   : > { %v3981_v7 = vpop.f32.mrf.mxu0 }
 0x971   : > { %v4613_v20 = vmul.f32 -1.702, %v3987_v18  ;;  %v3982_v25 = vadd.f32 %v4607_v23, %v3981_v7 }
 0x973   : > { %v4010_v22 = vmul.f32 1.442695, %v4613_v20  ;;  %v4612_v51 = vmul.f32 -1.702, %v3982_v25 }
 0x975   : > { %5197 = vpow2.f32 %v4010_v22  ;;  %v4008_v41 = vmul.f32 1.442695, %v4612_v51 }
 0x977   : > { %5199 = vpow2.f32 %v4008_v41 }
 0x979   : > { %v5016_v55 = vpop.f32.mrf.mxu0 }
 0x97a   : > { %v3997_v57 = vadd.f32 %v5016_v55, %v4607_v23 }
 0x97b   : > { %v3991_v58 = vpop.f32.mrf.mxu0 }
 0x97c   : > { %v4615_v63 = vmul.f32 -1.702, %v3997_v57  ;;  %v3992_v0 = vadd.f32 %v4607_v23, %v3991_v58 }
 0x97e   : > { %v4014_v24 = vmul.f32 1.442695, %v4615_v63  ;;  %v4614_v54 = vmul.f32 -1.702, %v3992_v0 }
 0x980   : > { %5201 = vpow2.f32 %v4014_v24  ;;  %v4012_v56 = vmul.f32 1.442695, %v4614_v54 }
 0x982   : > { %v5198_v1 = vpop.eup %5197  ;;  %5203 = vpow2.f32 %v4012_v56 }
 0x983   : > { %v4017_v2 = vadd.f32 1.0, %v5198_v1 }
 0x984   : > { %v5200_v52 = vpop.eup %5199 }
 0x985   : > { %v4016_v3 = vadd.f32 1.0, %v5200_v52  ;;  %5205 = vrcp.f32 %v4017_v2 }
 0x987   : > { %5207 = vrcp.f32 %v4016_v3 }
 0x98d   : > { %v5202_v15 = vpop.eup %5201 }
 0x98e   : > { %v4019_v4 = vadd.f32 1.0, %v5202_v15 }
 0x98f   : > { %v5204_v53 = vpop.eup %5203 }
 0x990   : > { %v4018_v6 = vadd.f32 1.0, %v5204_v53  ;;  %5209 = vrcp.f32 %v4019_v4 }
 0x992   : > { %5211 = vrcp.f32 %v4018_v6  ;;  %v5206_v26 = vpop.eup %5205 }
 0x993   : > { %v4029_v62 = vmul.f32 %v5206_v26, %v3987_v18 }
 0x994   : > { %v5208_v29 = vpop.eup %5207 }
 0x995   : > { %v4028_v17 = vmul.f32 %v5208_v29, %v3982_v25 }
 0x997   : > { %5049 = vmatprep.mubr.f32.mxu1 %v4028_v17 }
 0x998   : > { %5050 = vmatmul.mubr.f32.vlgmr.msra.gmra.mxu1 %v4029_v62 }
 0x99d   : > { %v5210_v31 = vpop.eup %5209 }
 0x99e   : > { %v4031_v19 = vmul.f32 %v5210_v31, %v3997_v57 }
 0x99f   : > { %v5212_v33 = vpop.eup %5211 }
 0x9a0   : > { %v4030_v12 = vmul.f32 %v5212_v33, %v3992_v0 }
 0x9a2   : > { %5052 = vmatprep.mubr.f32.mxu1 %v4030_v12 }
 0x9a3   : > { %5053 = vmatmul.mubr.f32.gmra.mxu1 %v4031_v19 }
 0xa58   : > { %v5051_v38 = vpop.f32.mrf.mxu1 }
 0xa59   : > { %v4150_v61 = vadd.f32 %v5051_v38, %v6012_v10 }
 0xa5a   : > { %v4130_v46 = vpop.f32.mrf.mxu1 }
 0xa5b   : > { %v4161_v47 = vadd.f32 %v4616_v14, %v4150_v61  ;;  %v4149_v34 = vadd.f32 %v4130_v46, %v6014_v28 }
 0xa5d   : > { %4165 = vst.msk [vmem:[#allocation2 + $0x8] sm:$0xff] %vm771_vm1, %v4161_v47  ;;  %v4160_v36 = vadd.f32 %v4616_v14, %v4149_v34 }
 0xa5f   : > { %4164 = vst.msk [vmem:[#allocation2] sm:$0xff] %vm771_vm1, %v4160_v36 }
 0xa63   : > { %v5054_v37 = vpop.f32.mrf.mxu1 }
 0xa64   : > { %v4152_v39 = vadd.f32 %v5054_v37, %v6022_v30 }
 0xa65   : > { %v4140_v59 = vpop.f32.mrf.mxu1 }
 0xa66   : > { %v4163_v27 = vadd.f32 %v4616_v14, %v4152_v39  ;;  %v4151_v40 = vadd.f32 %v4140_v59, %v6020_v49  ;;  %4171 = sbr.rel (%p4617_p2) target bundleno = 3491 (0xda3), region = 104 }
 0xa68   : > { %4167 = vst.msk [vmem:[#allocation2 + $0x18] sm:$0xff] %vm771_vm1, %v4163_v27  ;;  %v4162_v42 = vadd.f32 %v4616_v14, %v4151_v40 }
 0xa6a   : > { %4166 = vst.msk [vmem:[#allocation2 + $0x10] sm:$0xff] %vm771_vm1, %v4162_v42 }
 0xa6b   : > { %v4172_v10 = vld [vmem:[%s6159_s2] sm:$0xf]  ;;  %v5298_v43 = vmov 0   ;;  %v5299_v30 = vmov 0.0   ;;  %v4180_v49 = vld [vmem:[#allocation2 + $0x8] sm:$0xff]  ;;  %vm5300_vm7 = vmmov 0  }
 0xa6c   : > { %5217 = vset.pattern.permute.xlu0 %v5298_v43  ;;  %5055 = vmatprep.subr.mxu0 %v5299_v30  ;;  %v4179_v5 = vld [vmem:[#allocation2] sm:$0xff]  ;;  %vm4258_vm9 = vcmask 257024   ;;  %v4289_v23 = vld [vmem:[%s6160_s30 + $0x18] sm:$0xff]  ;;  %v4287_v8 = vld [vmem:[%s6160_s30 + $0x8] sm:$0xff] }
 0xa6d   : > { %4174 = vperm.xlu0 %5217, %v4172_v10   ;;  %5063 = vmatprep.mubr.msk.f32.mxu0 %vm5300_vm7, %v5299_v30  ;;  %v4286_v18 = vld [vmem:[%s6160_s30] sm:$0xff] }
 0xa6e   : > { %5066 = vmatprep.subr.mxu1 %v5299_v30  ;;  %5074 = vmatprep.mubr.msk.f32.mxu1 %vm5300_vm7, %v5299_v30  ;;  %v4620_v51 = vld [vmem:[%s6161_s24] ss:$0 sm:$0xff] }
 0xa6f   : > { %v4182_v28 = vld [vmem:[#allocation2 + $0x18] sm:$0xff]  ;;  %5067 = vmatpush3.msra.mxu1 %v4289_v23  ;;  %v4621_v55 = vld [vmem:[%s6162_s7] ss:$0 sm:$0xff] }
 0xa70   : > { %5056 = vmatpush3.msra.mxu0 %v4182_v28  ;;  %5068 = vmatprep.subr.mxu1 %v5299_v30 }
 0xa71   : > { %v4181_v44 = vld [vmem:[#allocation2 + $0x10] sm:$0xff]  ;;  %5057 = vmatprep.subr.mxu0 %v5299_v30 }
 0xa72   : > { %5058 = vmatpush3.msra.mxu0 %v4181_v44 }
 0xa73   : > { %5059 = vmatprep.subr.mxu0 %v5299_v30 }
 0xa74   : > { %5060 = vmatpush3.msra.mxu0 %v4180_v49 }
 0xa75   : > { %5061 = vmatprep.subr.mxu0 %v5299_v30 }
 0xa76   : > { %5062 = vmatpush3.msra.mxu0 %v4179_v5 }
 0xae8   : > { %v4175_v45 = vpop.permute.xlu0 %4174 }
 0xae9   : > { %vm4176_vm8 = vcmp.eq.s32.totalorder %v5700_v50, %v4175_v45  ;;  %v4288_v50 = vld [vmem:[%s6160_s30 + $0x10] sm:$0xff] }
 0xaea   : > { %v4618_v9 = vsel %vm4176_vm8, 1.0, %v5299_v30  ;;  %5069 = vmatpush3.msra.mxu1 %v4288_v50 }
 0xaeb   : > { %5064 = vmatmul.mubr.msk.f32.vlgmr.msra.gmra.mxu0 %vm771_vm1, %v4618_v9  ;;  %5070 = vmatprep.subr.mxu1 %v5299_v30 }
 0xaec   : > { %5071 = vmatpush3.msra.mxu1 %v4287_v8 }
 0xaed   : > { %5072 = vmatprep.subr.mxu1 %v5299_v30 }
 0xaee   : > { %5073 = vmatpush3.msra.mxu1 %v4286_v18 }
 0xbab   : > { %v4252_v13 = vpop.f32.mrf.mxu0 }
 0xbac   : > { %v4259_v32 = vsel %vm4258_vm9, %v4252_v13, 0.0 }
 0xbad   : > { %4260 = vadd.xlane.f32.xlu0 %v4259_v32  ;;  %v5065_v60 = vpop.f32.mrf.mxu0 }
 0xc36   : > { %v4261_v16 = vpop.xlane.xlu0 %4260 }
 0xc37   : > { %v4262_v48 = vmul.f32 0.03125, %v4261_v16 }
 0xc39   : > { %v4263_v11 = vsub.f32 %v4252_v13, %v4262_v48 }
 0xc3b   : > { %v4264_v21 = vmul.f32 %v4263_v11, %v4263_v11 }
 0xc3d   : > { %v4265_v35 = vsel %vm4258_vm9, %v4264_v21, 0.0 }
 0xc3e   : > { %4266 = vadd.xlane.f32.xlu1 %v4265_v35 }
 0xcc7   : > { %v4267_v7 = vpop.xlane.xlu1 %4266 }
 0xcc8   : > { %v4268_v20 = vmul.f32 0.03125, %v4267_v7 }
 0xcca   : > { %v4269_v25 = vadd.f32 1e-05, %v4268_v20 }
 0xccc   : > { %5218 = vrsqrt.f32 %v4269_v25 }
 0xcd9   : > { %v5219_v22 = vpop.eup %5218 }
 0xcda   : > { %v4271_v41 = vmul.f32 %v5219_v22, %v4263_v11 }
 0xcdc   : > { %v4278_v57 = vmul.f32 %v4620_v51, %v4271_v41 }
 0xcde   : > { %v4285_v58 = vadd.f32 %v4621_v55, %v4278_v57 }
 0xce0   : > { %5075 = vmatmul.mubr.msk.f32.vlgmr.msra.gmra.mxu1 %vm771_vm1, %v4285_v58 }
 0xda0   : > { %v4359_v63 = vpop.f32.mrf.mxu1 }
 0xda1   : > { %4363 = vst [vmem:[#allocation6] sm:$0xf] %v4359_v63 }
 0xda2   : > { %v5076_v0 = vpop.f32.mrf.mxu1 }
 0xda3 PF: > { %p5091_p3 = scmp.eq.s32.totalorder %s5403_s28, 1  ;;  %s5301_s25 = smov [#allocation6]  }
 0xda4   : > { %s4371_s22 = sshll.u32 %s5301_s25, 4  ;;  %s4372_s22 = int_to_ptr.vmem [resolvable:$true] %s4371_s22 }
 0xda5   : > { %s5246_s0 = scalar_lea.vmem %s4372_s22, 64  ;;  %p5253_p7 = scmp.lt.s32.totalorder %s4372_s22, %s4372_s22 }
 0xda6   : > { %p5247_p4 = scmp.ne.s32.totalorder %s4372_s22, %s5246_s0  ;;  %p5254_p8 = scmp.lt.s32.totalorder %s5246_s0, %s5246_s0 }
 0xda8   : > { %p5248_p5 = pnand %p5247_p4, %p5091_p3  ;;  %p5255_p9 = por %p5254_p8, %p5253_p7 }
 0xdaa   : > { %p5249_p6 = pneg %p5248_p5 }
 0xdac   : > { %p5256_p10 = pnand %p5255_p9, %p5249_p6 }
 0xdae   : > { %5259 = shalt.err (!%p5256_p10)
}
 0xdaf   : > { %s6163_s26 = sld [smem:[#allocation18_spill]] }
 0xdb5   : > { %5082 = dma.vmem_to_hbm [thread:$0]  (%p5091_p3), %s4372_s22, 64, %s6163_s26, [#allocation5]  }
 0xdb6   : > { %5279 = dma.done.wait (%p5091_p3), [#allocation5], 64  }
 0xdb7   : > { %5281 = vsyncadd (%p5091_p3), [#allocation5], 4294967232 }
 0xdb8 PF: > { %s6164_s19 = sld [smem:[#allocation9_spill]] }
 0xdbe   : > { %s30_s27 = sadd.s32 1, %s6164_s19  }
 0xdbf   : > { %p27_p11 = scmp.ge.s32.totalorder %s30_s27, 4  }
 0xdc1   :  { %29 = sbr.rel (!%p27_p11) target bundleno = 12 (0xc), region = 165 }
 0xdc6   :  { %4384 = vsyncpa [#allocation4], 1 }
 0xdc7   :  { %4386 = vsyncpa [#allocation4 + $0x1], 1 }
 0xdc8   :  { %4387 = vsyncpa [#allocation5], 1 }
 0xdc9   :  { %4389 = vsyncpa [#allocation5 + $0x1], 1 }

</bundles_post_ra>
